<compile_context>
chip_gen: v6e
topology: v6e:2x2x1
jax: 0.10.0
libtpu: 0.0.40
codegen_flags: <defaults>
</compile_context>

<pallas_src>
import functools

import jax
import jax.numpy as jnp
from jax.experimental import pallas as pl
from jax.experimental.pallas import tpu as pltpu


# --------------------------------------------------------------------------
# Fused transformer-block kernel (LN1 + QKV + Based attention + LN2 + MLP)
# --------------------------------------------------------------------------

def _block_kernel(x_ref, ln1g_ref, ln1b_ref, wqkv_ref, bqkv_ref,
                  ln2g_ref, ln2b_ref, w1_ref, b1_ref, w2_ref, b2_ref,
                  o_ref, *, H, dp, dh, window):
    f32, bf16 = jnp.float32, jnp.bfloat16

    x = x_ref[0].astype(f32)                                    # [T, D]
    T = x.shape[0]

    def ln(z, g, b):  # torch.nn.LayerNorm, eps=1e-5
        mu = jnp.mean(z, axis=-1, keepdims=True)
        var = jnp.mean((z - mu) ** 2, axis=-1, keepdims=True)
        return (z - mu) * jax.lax.rsqrt(var + 1e-5) * g + b

    # ---- LN1 + fused QKV projection (one MXU matmul, bf16 operands) ----
    h1 = ln(x, ln1g_ref[...], ln1b_ref[...])
    qkv = jnp.dot(h1.astype(bf16), wqkv_ref[...].astype(bf16),
                  preferred_element_type=f32) + bqkv_ref[...]   # [T, 3*H*dp]

    # Masks shared by all heads (built once per grid step).
    row = jax.lax.broadcasted_iota(jnp.int32, (T, T), 0)
    col = jax.lax.broadcasted_iota(jnp.int32, (T, T), 1)
    causal = col <= row
    win = causal & (col > row - window)   # `window` keys incl. current token

    q_off, k_off, v_off = 0, H * dp, 2 * H * dp
    head_outs = []
    for hd in range(H):                   # static unroll, H is small
        q_h = qkv[:, q_off + hd * dp: q_off + (hd + 1) * dp]
        k_h = qkv[:, k_off + hd * dp: k_off + (hd + 1) * dp]
        v_h = qkv[:, v_off + hd * dh: v_off + (hd + 1) * dh].astype(bf16)

        # scores (no 1/sqrt(d) scaling in the reference)
        s = jax.lax.dot_general(q_h.astype(bf16), k_h.astype(bf16),
                                (((1,), (1,)), ((), ())),
                                preferred_element_type=f32)     # [T, T]

        # "Based" linear attention: phi(q).phi(k) = 1 + s + 0.5*s^2, causal.
        a_lin = jnp.where(causal, 1.0 + s + 0.5 * s * s, 0.0)
        num = jnp.dot(a_lin.astype(bf16), v_h, preferred_element_type=f32)
        den = jnp.sum(a_lin, axis=-1, keepdims=True) + 1e-8
        y_lin = num * pl.reciprocal(den, approx=True)

        # Sliding-window softmax attention (exp(-inf)=0 handles the masking;
        # the diagonal is always in-window so the row max is finite).
        s_m = jnp.where(win, s, -jnp.inf)
        m = jnp.max(s_m, axis=-1, keepdims=True)
        p = jnp.exp(s_m - m)
        l = jnp.sum(p, axis=-1, keepdims=True)
        y_loc = jnp.dot(p.astype(bf16), v_h,
                        preferred_element_type=f32) * pl.reciprocal(l, approx=True)

        head_outs.append(y_lin + y_loc)

    attn = jnp.concatenate(head_outs, axis=-1)                  # [T, H*dh]
    x = x + attn                                                # residual 1

    # ---- LN2 + MLP (fused) ----
    h2 = ln(x, ln2g_ref[...], ln2b_ref[...])
    m1 = jnp.dot(h2.astype(bf16), w1_ref[...].astype(bf16),
                 preferred_element_type=f32) + b1_ref[...]
    m1 = jnp.maximum(m1, 0.0)
    # TODO(synk): nn.Dropout is stochastic; treated as identity (eval mode).
    m2 = jnp.dot(m1.astype(bf16), w2_ref[...].astype(bf16),
                 preferred_element_type=f32) + b2_ref[...]
    x = x + m2                                                  # residual 2

    o_ref[0] = x.astype(o_ref.dtype)


def based_block(x, blk, *, H, dp, dh, window):
    """x: [B, T, D] -> [B, T, D]; one fused pallas_call per transformer block."""
    B, T, D = x.shape
    n3 = blk["wqkv"].shape[1]
    hidden = blk["w1"].shape[1]

    def full(shape):
        return pl.BlockSpec(shape, lambda b: (0,) * len(shape))

    kern = functools.partial(_block_kernel, H=H, dp=dp, dh=dh, window=window)
    return pl.pallas_call(
        kern,
        out_shape=jax.ShapeDtypeStruct((B, T, D), x.dtype),
        grid=(B,),
        in_specs=[
            pl.BlockSpec((1, T, D), lambda b: (b, 0, 0)),   # x
            full((1, D)), full((1, D)),                      # ln1 gamma/beta
            full((D, n3)), full((1, n3)),                    # fused Wqkv / bqkv
            full((1, D)), full((1, D)),                      # ln2 gamma/beta
            full((D, hidden)), full((1, hidden)),            # W1 / b1
            full((hidden, D)), full((1, D)),                 # W2 / b2
        ],
        out_specs=pl.BlockSpec((1, T, D), lambda b: (b, 0, 0)),
        compiler_params=pltpu.CompilerParams(
            dimension_semantics=("parallel",),
            vmem_limit_bytes=32 * 1024 * 1024),
    )(x,
      blk["ln1_g"].reshape(1, D), blk["ln1_b"].reshape(1, D),
      blk["wqkv"], blk["bqkv"].reshape(1, n3),
      blk["ln2_g"].reshape(1, D), blk["ln2_b"].reshape(1, D),
      blk["w1"], blk["b1"].reshape(1, hidden),
      blk["w2"], blk["b2"].reshape(1, D))


# --------------------------------------------------------------------------
# Fused final LayerNorm + LM head kernel
# --------------------------------------------------------------------------

def _lnf_head_kernel(x_ref, g_ref, b_ref, w_ref, hb_ref, o_ref):
    x = x_ref[...].astype(jnp.float32)
    mu = jnp.mean(x, axis=-1, keepdims=True)
    var = jnp.mean((x - mu) ** 2, axis=-1, keepdims=True)
    h = (x - mu) * jax.lax.rsqrt(var + 1e-5) * g_ref[...] + b_ref[...]
    y = jnp.dot(h.astype(jnp.bfloat16), w_ref[...].astype(jnp.bfloat16),
                preferred_element_type=jnp.float32) + hb_ref[...]
    o_ref[...] = y.astype(o_ref.dtype)


def lnf_head(x, g, b, w, hb):
    """x: [M, D] -> logits [M, V]; LN fused into the head matmul, row-tiled."""
    M, D = x.shape
    V = w.shape[1]
    tm = M if M <= 256 else 256
    assert M % tm == 0, "demo shapes keep the row dimension divisible"
    return pl.pallas_call(
        _lnf_head_kernel,
        out_shape=jax.ShapeDtypeStruct((M, V), x.dtype),
        grid=(M // tm,),
        in_specs=[
            pl.BlockSpec((tm, D), lambda i: (i, 0)),
            pl.BlockSpec((1, D), lambda i: (0, 0)),
            pl.BlockSpec((1, D), lambda i: (0, 0)),
            pl.BlockSpec((D, V), lambda i: (0, 0)),
            pl.BlockSpec((1, V), lambda i: (0, 0)),
        ],
        out_specs=pl.BlockSpec((tm, V), lambda i: (i, 0)),
        compiler_params=pltpu.CompilerParams(
            dimension_semantics=("parallel",),
            vmem_limit_bytes=32 * 1024 * 1024),
    )(x, g.reshape(1, D), b.reshape(1, D), w, hb.reshape(1, V))


# --------------------------------------------------------------------------
# Parameters & model assembly
# --------------------------------------------------------------------------

def init_params(key, vocab_size, embed_dim, num_layers, num_heads, mlp_ratio,
                block_size):
    d_head = embed_dim // num_heads
    d_proj = d_head                       # BasedAttention default (d_proj=None)
    hidden = int(embed_dim * mlp_ratio)

    def lin(k, din, dout):
        return jax.random.normal(k, (din, dout), jnp.float32) * 0.02

    keys = jax.random.split(key, 3 + num_layers)
    params = {
        "tok_emb": jax.random.normal(keys[0], (vocab_size, embed_dim)) * 0.02,
        "pos_emb": jax.random.normal(keys[1], (block_size, embed_dim)) * 0.02,
        "lnf_g": jnp.ones((embed_dim,), jnp.float32),
        "lnf_b": jnp.zeros((embed_dim,), jnp.float32),
        "head_w": lin(keys[2], embed_dim, vocab_size),
        "head_b": jnp.zeros((vocab_size,), jnp.float32),
        "blocks": [],
    }
    n_qkv = num_heads * (2 * d_proj + d_head)
    for l in range(num_layers):
        bk = jax.random.split(keys[3 + l], 5)
        wq = lin(bk[0], embed_dim, num_heads * d_proj)
        wk = lin(bk[1], embed_dim, num_heads * d_proj)
        wv = lin(bk[2], embed_dim, num_heads * d_head)
        params["blocks"].append({
            "ln1_g": jnp.ones((embed_dim,), jnp.float32),
            "ln1_b": jnp.zeros((embed_dim,), jnp.float32),
            "wqkv": jnp.concatenate([wq, wk, wv], axis=1),   # fused [D, 3*H*dp]
            "bqkv": jnp.zeros((n_qkv,), jnp.float32),
            "ln2_g": jnp.ones((embed_dim,), jnp.float32),
            "ln2_b": jnp.zeros((embed_dim,), jnp.float32),
            "w1": lin(bk[3], embed_dim, hidden),
            "b1": jnp.zeros((hidden,), jnp.float32),
            "w2": lin(bk[4], hidden, embed_dim),
            "b2": jnp.zeros((embed_dim,), jnp.float32),
        })
    return params


def transformer_forward(params, idx, *, num_heads, window):
    B, T = idx.shape
    D = params["tok_emb"].shape[1]
    H = num_heads
    dh = D // H
    dp = params["blocks"][0]["wqkv"].shape[1] // (3 * H)

    # TODO(synk): embedding lookup is a data-dependent gather; kept in plain JAX
    # (a Pallas version would need a manual DMA gather).
    x = params["tok_emb"][idx] + params["pos_emb"][:T][None, :, :]   # [B, T, D]

    for blk in params["blocks"]:
        x = based_block(x, blk, H=H, dp=dp, dh=dh, window=window)

    logits = lnf_head(x.reshape(B * T, D), params["lnf_g"], params["lnf_b"],
                      params["head_w"], params["head_b"])
    return logits.reshape(B, T, -1)


# --------------------------------------------------------------------------
# Main
# --------------------------------------------------------------------------

if __name__ == "__main__":
    vocab_size = 50
    embed_dim = 32
    num_layers = 2
    num_heads = 4
    mlp_ratio = 4.0
    block_size = 16
    window_size = 8

    B, T = 2, 16

    key = jax.random.PRNGKey(0)
    pkey, ikey = jax.random.split(key)
    params = init_params(pkey, vocab_size, embed_dim, num_layers, num_heads,
                         mlp_ratio, block_size)
    idx = jax.random.randint(ikey, (B, T), 0, vocab_size, dtype=jnp.int32)

    fwd = jax.jit(functools.partial(transformer_forward,
                                    num_heads=num_heads, window=window_size))
    logits = jax.block_until_ready(fwd(params, idx))

    assert logits.shape == (B, T, vocab_size)
    assert bool(jnp.all(jnp.isfinite(logits)))
    print("KERNEL_OK")
</pallas_src>

<mosaic_0001>
module attributes {stable_mosaic.version = 11 : i64} {
  func.func @_lnf_head_kernel(%arg0: i32, %arg1: memref<32x32xf32, #tpu.memory_space<vmem>>, %arg2: memref<1x32xf32, #tpu.memory_space<vmem>>, %arg3: memref<1x32xf32, #tpu.memory_space<vmem>>, %arg4: memref<32x50xf32, #tpu.memory_space<vmem>>, %arg5: memref<1x50xf32, #tpu.memory_space<vmem>>, %arg6: memref<32x50xf32, #tpu.memory_space<vmem>>) attributes {dimension_semantics = [#tpu.dimension_semantics<parallel>], iteration_bounds = array<i64: 1>, scalar_prefetch = 0 : i64, scratch_operands = 0 : i64, tpu.core_type = #tpu.core_type<tc>, window_params = [{transform_indices = @transform_0, window_bounds = array<i64: 32, 32>}, {pipeline_mode = #tpu.pipeline_mode<synchronous>, transform_indices = @transform_1, window_bounds = array<i64: 1, 32>}, {pipeline_mode = #tpu.pipeline_mode<synchronous>, transform_indices = @transform_2, window_bounds = array<i64: 1, 32>}, {pipeline_mode = #tpu.pipeline_mode<synchronous>, transform_indices = @transform_3, window_bounds = array<i64: 32, 50>}, {pipeline_mode = #tpu.pipeline_mode<synchronous>, transform_indices = @transform_4, window_bounds = array<i64: 1, 50>}, {transform_indices = @transform_5, window_bounds = array<i64: 32, 50>}]} {
    %c0 = arith.constant 0 : index
    %c0_0 = arith.constant 0 : index
    %0 = vector.load %arg1[%c0, %c0_0] : memref<32x32xf32, #tpu.memory_space<vmem>>, vector<32x32xf32>
    %cst = arith.constant dense<0.000000e+00> : vector<32xf32>
    %1 = vector.multi_reduction <add>, %0, %cst [1] : vector<32x32xf32> to vector<32xf32>
    %2 = vector.shape_cast %1 : vector<32xf32> to vector<32x1xf32>
    %cst_1 = arith.constant 3.200000e+01 : f32
    %3 = vector.broadcast %cst_1 : f32 to vector<32x1xf32>
    %4 = arith.divf %2, %3 : vector<32x1xf32>
    %5 = vector.broadcast %4 : vector<32x1xf32> to vector<32x32xf32>
    %6 = arith.subf %0, %5 : vector<32x32xf32>
    %7 = arith.mulf %6, %6 : vector<32x32xf32>
    %cst_2 = arith.constant dense<0.000000e+00> : vector<32xf32>
    %8 = vector.multi_reduction <add>, %7, %cst_2 [1] : vector<32x32xf32> to vector<32xf32>
    %9 = vector.shape_cast %8 : vector<32xf32> to vector<32x1xf32>
    %cst_3 = arith.constant 3.200000e+01 : f32
    %10 = vector.broadcast %cst_3 : f32 to vector<32x1xf32>
    %11 = arith.divf %9, %10 : vector<32x1xf32>
    %12 = vector.broadcast %4 : vector<32x1xf32> to vector<32x32xf32>
    %13 = arith.subf %0, %12 : vector<32x32xf32>
    %cst_4 = arith.constant 9.99999974E-6 : f32
    %14 = vector.broadcast %cst_4 : f32 to vector<32x1xf32>
    %15 = arith.addf %11, %14 : vector<32x1xf32>
    %16 = math.rsqrt %15 : vector<32x1xf32>
    %17 = vector.broadcast %16 : vector<32x1xf32> to vector<32x32xf32>
    %18 = arith.mulf %13, %17 : vector<32x32xf32>
    %c0_5 = arith.constant 0 : index
    %c0_6 = arith.constant 0 : index
    %19 = vector.load %arg2[%c0_5, %c0_6] : memref<1x32xf32, #tpu.memory_space<vmem>>, vector<1x32xf32>
    %20 = vector.broadcast %19 : vector<1x32xf32> to vector<32x32xf32>
    %21 = arith.mulf %18, %20 : vector<32x32xf32>
    %c0_7 = arith.constant 0 : index
    %c0_8 = arith.constant 0 : index
    %22 = vector.load %arg3[%c0_7, %c0_8] : memref<1x32xf32, #tpu.memory_space<vmem>>, vector<1x32xf32>
    %23 = vector.broadcast %22 : vector<1x32xf32> to vector<32x32xf32>
    %24 = arith.addf %21, %23 : vector<32x32xf32>
    %25 = arith.truncf %24 : vector<32x32xf32> to vector<32x32xbf16>
    %c0_9 = arith.constant 0 : index
    %c0_10 = arith.constant 0 : index
    %26 = vector.load %arg4[%c0_9, %c0_10] : memref<32x50xf32, #tpu.memory_space<vmem>>, vector<32x50xf32>
    %27 = arith.truncf %26 : vector<32x50xf32> to vector<32x50xbf16>
    %cst_11 = arith.constant dense<0.000000e+00> : vector<32x50xf32>
    %28 = tpu.matmul %25, %27, %cst_11 {dimension_numbers = #tpu.dot_dimension_numbers<[1], [0], [0], [1], [0, 0, 1, 1], [], []>} : vector<32x32xbf16>, vector<32x50xbf16>, vector<32x50xf32> -> vector<32x50xf32>
    %c0_12 = arith.constant 0 : index
    %c0_13 = arith.constant 0 : index
    %29 = vector.load %arg5[%c0_12, %c0_13] : memref<1x50xf32, #tpu.memory_space<vmem>>, vector<1x50xf32>
    %30 = vector.broadcast %29 : vector<1x50xf32> to vector<32x50xf32>
    %31 = arith.addf %28, %30 : vector<32x50xf32>
    %c0_14 = arith.constant 0 : index
    %c0_15 = arith.constant 0 : index
    %32 = vector.load %arg6[%c0_14, %c0_15] : memref<32x50xf32, #tpu.memory_space<vmem>>, vector<32x50xf32>
    tpu.vector_store %arg6[%c0_14, %c0_15], %31 {strides = array<i32>} : memref<32x50xf32, #tpu.memory_space<vmem>>, vector<32x50xf32>,
    return
  }
  func.func @transform_0(%arg0: i32) -> (i32, i32) {
    %c0_i32 = arith.constant 0 : i32
    %c0_i32_0 = arith.constant 0 : i32
    return %arg0, %c0_i32 : i32, i32
  }
  func.func @transform_1(%arg0: i32) -> (i32, i32) {
    %c0_i32 = arith.constant 0 : i32
    %c0_i32_0 = arith.constant 0 : i32
    %c0_i32_1 = arith.constant 0 : i32
    return %c0_i32, %c0_i32_0 : i32, i32
  }
  func.func @transform_2(%arg0: i32) -> (i32, i32) {
    %c0_i32 = arith.constant 0 : i32
    %c0_i32_0 = arith.constant 0 : i32
    %c0_i32_1 = arith.constant 0 : i32
    return %c0_i32, %c0_i32_0 : i32, i32
  }
  func.func @transform_3(%arg0: i32) -> (i32, i32) {
    %c0_i32 = arith.constant 0 : i32
    %c0_i32_0 = arith.constant 0 : i32
    %c0_i32_1 = arith.constant 0 : i32
    return %c0_i32, %c0_i32_0 : i32, i32
  }
  func.func @transform_4(%arg0: i32) -> (i32, i32) {
    %c0_i32 = arith.constant 0 : i32
    %c0_i32_0 = arith.constant 0 : i32
    %c0_i32_1 = arith.constant 0 : i32
    return %c0_i32, %c0_i32_0 : i32, i32
  }
  func.func @transform_5(%arg0: i32) -> (i32, i32) {
    %c0_i32 = arith.constant 0 : i32
    %c0_i32_0 = arith.constant 0 : i32
    return %arg0, %c0_i32 : i32, i32
  }
}

module attributes {stable_mosaic.version = 11 : i64} {
  func.func @_block_kernel(%arg0: i32, %arg1: memref<1x16x32xf32, #tpu.memory_space<vmem>>, %arg2: memref<1x32xf32, #tpu.memory_space<vmem>>, %arg3: memref<1x32xf32, #tpu.memory_space<vmem>>, %arg4: memref<32x96xf32, #tpu.memory_space<vmem>>, %arg5: memref<1x96xf32, #tpu.memory_space<vmem>>, %arg6: memref<1x32xf32, #tpu.memory_space<vmem>>, %arg7: memref<1x32xf32, #tpu.memory_space<vmem>>, %arg8: memref<32x128xf32, #tpu.memory_space<vmem>>, %arg9: memref<1x128xf32, #tpu.memory_space<vmem>>, %arg10: memref<128x32xf32, #tpu.memory_space<vmem>>, %arg11: memref<1x32xf32, #tpu.memory_space<vmem>>, %arg12: memref<1x16x32xf32, #tpu.memory_space<vmem>>) attributes {dimension_semantics = [#tpu.dimension_semantics<parallel>], iteration_bounds = array<i64: 2>, scalar_prefetch = 0 : i64, scratch_operands = 0 : i64, tpu.core_type = #tpu.core_type<tc>, window_params = [{transform_indices = @transform_0, window_bounds = array<i64: 1, 16, 32>}, {pipeline_mode = #tpu.pipeline_mode<synchronous>, transform_indices = @transform_1, window_bounds = array<i64: 1, 32>}, {pipeline_mode = #tpu.pipeline_mode<synchronous>, transform_indices = @transform_2, window_bounds = array<i64: 1, 32>}, {pipeline_mode = #tpu.pipeline_mode<synchronous>, transform_indices = @transform_3, window_bounds = array<i64: 32, 96>}, {pipeline_mode = #tpu.pipeline_mode<synchronous>, transform_indices = @transform_4, window_bounds = array<i64: 1, 96>}, {pipeline_mode = #tpu.pipeline_mode<synchronous>, transform_indices = @transform_5, window_bounds = array<i64: 1, 32>}, {pipeline_mode = #tpu.pipeline_mode<synchronous>, transform_indices = @transform_6, window_bounds = array<i64: 1, 32>}, {pipeline_mode = #tpu.pipeline_mode<synchronous>, transform_indices = @transform_7, window_bounds = array<i64: 32, 128>}, {pipeline_mode = #tpu.pipeline_mode<synchronous>, transform_indices = @transform_8, window_bounds = array<i64: 1, 128>}, {pipeline_mode = #tpu.pipeline_mode<synchronous>, transform_indices = @transform_9, window_bounds = array<i64: 128, 32>}, {pipeline_mode = #tpu.pipeline_mode<synchronous>, transform_indices = @transform_10, window_bounds = array<i64: 1, 32>}, {transform_indices = @transform_11, window_bounds = array<i64: 1, 16, 32>}]} {
    %c0 = arith.constant 0 : index
    %c0_0 = arith.constant 0 : index
    %c0_1 = arith.constant 0 : index
    %0 = vector.load %arg1[%c0, %c0_0, %c0_1] : memref<1x16x32xf32, #tpu.memory_space<vmem>>, vector<1x16x32xf32>
    %1 = vector.shape_cast %0 : vector<1x16x32xf32> to vector<16x32xf32>
    %c0_2 = arith.constant 0 : index
    %c0_3 = arith.constant 0 : index
    %2 = vector.load %arg2[%c0_2, %c0_3] : memref<1x32xf32, #tpu.memory_space<vmem>>, vector<1x32xf32>
    %c0_4 = arith.constant 0 : index
    %c0_5 = arith.constant 0 : index
    %3 = vector.load %arg3[%c0_4, %c0_5] : memref<1x32xf32, #tpu.memory_space<vmem>>, vector<1x32xf32>
    %cst = arith.constant dense<0.000000e+00> : vector<16xf32>
    %4 = vector.multi_reduction <add>, %1, %cst [1] : vector<16x32xf32> to vector<16xf32>
    %5 = vector.shape_cast %4 : vector<16xf32> to vector<16x1xf32>
    %cst_6 = arith.constant 3.200000e+01 : f32
    %6 = vector.broadcast %cst_6 : f32 to vector<16x1xf32>
    %7 = arith.divf %5, %6 : vector<16x1xf32>
    %8 = vector.broadcast %7 : vector<16x1xf32> to vector<16x32xf32>
    %9 = arith.subf %1, %8 : vector<16x32xf32>
    %10 = arith.mulf %9, %9 : vector<16x32xf32>
    %cst_7 = arith.constant dense<0.000000e+00> : vector<16xf32>
    %11 = vector.multi_reduction <add>, %10, %cst_7 [1] : vector<16x32xf32> to vector<16xf32>
    %12 = vector.shape_cast %11 : vector<16xf32> to vector<16x1xf32>
    %cst_8 = arith.constant 3.200000e+01 : f32
    %13 = vector.broadcast %cst_8 : f32 to vector<16x1xf32>
    %14 = arith.divf %12, %13 : vector<16x1xf32>
    %15 = vector.broadcast %7 : vector<16x1xf32> to vector<16x32xf32>
    %16 = arith.subf %1, %15 : vector<16x32xf32>
    %cst_9 = arith.constant 9.99999974E-6 : f32
    %17 = vector.broadcast %cst_9 : f32 to vector<16x1xf32>
    %18 = arith.addf %14, %17 : vector<16x1xf32>
    %19 = math.rsqrt %18 : vector<16x1xf32>
    %20 = vector.broadcast %19 : vector<16x1xf32> to vector<16x32xf32>
    %21 = arith.mulf %16, %20 : vector<16x32xf32>
    %22 = vector.broadcast %2 : vector<1x32xf32> to vector<16x32xf32>
    %23 = arith.mulf %21, %22 : vector<16x32xf32>
    %24 = vector.broadcast %3 : vector<1x32xf32> to vector<16x32xf32>
    %25 = arith.addf %23, %24 : vector<16x32xf32>
    %26 = arith.truncf %25 : vector<16x32xf32> to vector<16x32xbf16>
    %c0_10 = arith.constant 0 : index
    %c0_11 = arith.constant 0 : index
    %27 = vector.load %arg4[%c0_10, %c0_11] : memref<32x96xf32, #tpu.memory_space<vmem>>, vector<32x96xf32>
    %28 = arith.truncf %27 : vector<32x96xf32> to vector<32x96xbf16>
    %cst_12 = arith.constant dense<0.000000e+00> : vector<16x96xf32>
    %29 = tpu.matmul %26, %28, %cst_12 {dimension_numbers = #tpu.dot_dimension_numbers<[1], [0], [0], [1], [0, 0, 1, 1], [], []>} : vector<16x32xbf16>, vector<32x96xbf16>, vector<16x96xf32> -> vector<16x96xf32>
    %c0_13 = arith.constant 0 : index
    %c0_14 = arith.constant 0 : index
    %30 = vector.load %arg5[%c0_13, %c0_14] : memref<1x96xf32, #tpu.memory_space<vmem>>, vector<1x96xf32>
    %31 = vector.broadcast %30 : vector<1x96xf32> to vector<16x96xf32>
    %32 = arith.addf %29, %31 : vector<16x96xf32>
    %33 = tpu.iota {dimensions = array<i32: 0>} : vector<16x16xi32>
    %34 = tpu.iota {dimensions = array<i32: 1>} : vector<16x16xi32>
    %35 = arith.cmpi sle, %34, %33 : vector<16x16xi32>
    %c8_i32 = arith.constant 8 : i32
    %36 = vector.broadcast %c8_i32 : i32 to vector<16x16xi32>
    %37 = arith.subi %33, %36 : vector<16x16xi32>
    %38 = arith.cmpi sgt, %34, %37 : vector<16x16xi32>
    %39 = arith.andi %35, %38 : vector<16x16xi1>
    %40 = vector.extract_strided_slice %32 {offsets = [0, 0], sizes = [16, 8], strides = [1, 1]} : vector<16x96xf32> to vector<16x8xf32>
    %41 = vector.extract_strided_slice %32 {offsets = [0, 32], sizes = [16, 8], strides = [1, 1]} : vector<16x96xf32> to vector<16x8xf32>
    %42 = vector.extract_strided_slice %32 {offsets = [0, 64], sizes = [16, 8], strides = [1, 1]} : vector<16x96xf32> to vector<16x8xf32>
    %43 = arith.truncf %42 : vector<16x8xf32> to vector<16x8xbf16>
    %44 = arith.truncf %40 : vector<16x8xf32> to vector<16x8xbf16>
    %45 = arith.truncf %41 : vector<16x8xf32> to vector<16x8xbf16>
    %cst_15 = arith.constant dense<0.000000e+00> : vector<16x16xf32>
    %46 = tpu.matmul %44, %45, %cst_15 {dimension_numbers = #tpu.dot_dimension_numbers<[1], [1], [0], [0], [0, 0, 1, 0], [], []>} : vector<16x8xbf16>, vector<16x8xbf16>, vector<16x16xf32> -> vector<16x16xf32>
    %cst_16 = arith.constant 1.000000e+00 : f32
    %47 = vector.broadcast %cst_16 : f32 to vector<16x16xf32>
    %48 = arith.addf %47, %46 : vector<16x16xf32>
    %cst_17 = arith.constant 5.000000e-01 : f32
    %49 = vector.broadcast %cst_17 : f32 to vector<16x16xf32>
    %50 = arith.mulf %49, %46 : vector<16x16xf32>
    %51 = arith.mulf %50, %46 : vector<16x16xf32>
    %52 = arith.addf %48, %51 : vector<16x16xf32>
    %cst_18 = arith.constant 0.000000e+00 : f32
    %53 = vector.broadcast %cst_18 : f32 to vector<16x16xf32>
    %54 = arith.select %35, %52, %53 : vector<16x16xi1>, vector<16x16xf32>
    %55 = arith.truncf %54 : vector<16x16xf32> to vector<16x16xbf16>
    %cst_19 = arith.constant dense<0.000000e+00> : vector<16x8xf32>
    %56 = tpu.matmul %55, %43, %cst_19 {dimension_numbers = #tpu.dot_dimension_numbers<[1], [0], [0], [1], [0, 0, 1, 1], [], []>} : vector<16x16xbf16>, vector<16x8xbf16>, vector<16x8xf32> -> vector<16x8xf32>
    %cst_20 = arith.constant dense<0.000000e+00> : vector<16xf32>
    %57 = vector.multi_reduction <add>, %54, %cst_20 [1] : vector<16x16xf32> to vector<16xf32>
    %58 = vector.shape_cast %57 : vector<16xf32> to vector<16x1xf32>
    %cst_21 = arith.constant 9.99999993E-9 : f32
    %59 = vector.broadcast %cst_21 : f32 to vector<16x1xf32>
    %60 = arith.addf %58, %59 : vector<16x1xf32>
    %61 = tpu.reciprocal %60 {approx = true} : vector<16x1xf32> -> vector<16x1xf32>
    %62 = vector.broadcast %61 : vector<16x1xf32> to vector<16x8xf32>
    %63 = arith.mulf %56, %62 : vector<16x8xf32>
    %cst_22 = arith.constant 0xFF800000 : f32
    %64 = vector.broadcast %cst_22 : f32 to vector<16x16xf32>
    %65 = arith.select %39, %46, %64 : vector<16x16xi1>, vector<16x16xf32>
    %cst_23 = arith.constant dense<0xFF800000> : vector<16xf32>
    %66 = vector.multi_reduction <maximumf>, %65, %cst_23 [1] : vector<16x16xf32> to vector<16xf32>
    %67 = vector.shape_cast %66 : vector<16xf32> to vector<16x1xf32>
    %68 = vector.broadcast %67 : vector<16x1xf32> to vector<16x16xf32>
    %69 = arith.subf %65, %68 : vector<16x16xf32>
    %70 = math.exp %69 : vector<16x16xf32>
    %cst_24 = arith.constant dense<0.000000e+00> : vector<16xf32>
    %71 = vector.multi_reduction <add>, %70, %cst_24 [1] : vector<16x16xf32> to vector<16xf32>
    %72 = vector.shape_cast %71 : vector<16xf32> to vector<16x1xf32>
    %73 = arith.truncf %70 : vector<16x16xf32> to vector<16x16xbf16>
    %cst_25 = arith.constant dense<0.000000e+00> : vector<16x8xf32>
    %74 = tpu.matmul %73, %43, %cst_25 {dimension_numbers = #tpu.dot_dimension_numbers<[1], [0], [0], [1], [0, 0, 1, 1], [], []>} : vector<16x16xbf16>, vector<16x8xbf16>, vector<16x8xf32> -> vector<16x8xf32>
    %75 = tpu.reciprocal %72 {approx = true} : vector<16x1xf32> -> vector<16x1xf32>
    %76 = vector.broadcast %75 : vector<16x1xf32> to vector<16x8xf32>
    %77 = arith.mulf %74, %76 : vector<16x8xf32>
    %78 = arith.addf %63, %77 : vector<16x8xf32>
    %79 = vector.extract_strided_slice %32 {offsets = [0, 8], sizes = [16, 8], strides = [1, 1]} : vector<16x96xf32> to vector<16x8xf32>
    %80 = vector.extract_strided_slice %32 {offsets = [0, 40], sizes = [16, 8], strides = [1, 1]} : vector<16x96xf32> to vector<16x8xf32>
    %81 = vector.extract_strided_slice %32 {offsets = [0, 72], sizes = [16, 8], strides = [1, 1]} : vector<16x96xf32> to vector<16x8xf32>
    %82 = arith.truncf %81 : vector<16x8xf32> to vector<16x8xbf16>
    %83 = arith.truncf %79 : vector<16x8xf32> to vector<16x8xbf16>
    %84 = arith.truncf %80 : vector<16x8xf32> to vector<16x8xbf16>
    %cst_26 = arith.constant dense<0.000000e+00> : vector<16x16xf32>
    %85 = tpu.matmul %83, %84, %cst_26 {dimension_numbers = #tpu.dot_dimension_numbers<[1], [1], [0], [0], [0, 0, 1, 0], [], []>} : vector<16x8xbf16>, vector<16x8xbf16>, vector<16x16xf32> -> vector<16x16xf32>
    %cst_27 = arith.constant 1.000000e+00 : f32
    %86 = vector.broadcast %cst_27 : f32 to vector<16x16xf32>
    %87 = arith.addf %86, %85 : vector<16x16xf32>
    %cst_28 = arith.constant 5.000000e-01 : f32
    %88 = vector.broadcast %cst_28 : f32 to vector<16x16xf32>
    %89 = arith.mulf %88, %85 : vector<16x16xf32>
    %90 = arith.mulf %89, %85 : vector<16x16xf32>
    %91 = arith.addf %87, %90 : vector<16x16xf32>
    %cst_29 = arith.constant 0.000000e+00 : f32
    %92 = vector.broadcast %cst_29 : f32 to vector<16x16xf32>
    %93 = arith.select %35, %91, %92 : vector<16x16xi1>, vector<16x16xf32>
    %94 = arith.truncf %93 : vector<16x16xf32> to vector<16x16xbf16>
    %cst_30 = arith.constant dense<0.000000e+00> : vector<16x8xf32>
    %95 = tpu.matmul %94, %82, %cst_30 {dimension_numbers = #tpu.dot_dimension_numbers<[1], [0], [0], [1], [0, 0, 1, 1], [], []>} : vector<16x16xbf16>, vector<16x8xbf16>, vector<16x8xf32> -> vector<16x8xf32>
    %cst_31 = arith.constant dense<0.000000e+00> : vector<16xf32>
    %96 = vector.multi_reduction <add>, %93, %cst_31 [1] : vector<16x16xf32> to vector<16xf32>
    %97 = vector.shape_cast %96 : vector<16xf32> to vector<16x1xf32>
    %cst_32 = arith.constant 9.99999993E-9 : f32
    %98 = vector.broadcast %cst_32 : f32 to vector<16x1xf32>
    %99 = arith.addf %97, %98 : vector<16x1xf32>
    %100 = tpu.reciprocal %99 {approx = true} : vector<16x1xf32> -> vector<16x1xf32>
    %101 = vector.broadcast %100 : vector<16x1xf32> to vector<16x8xf32>
    %102 = arith.mulf %95, %101 : vector<16x8xf32>
    %cst_33 = arith.constant 0xFF800000 : f32
    %103 = vector.broadcast %cst_33 : f32 to vector<16x16xf32>
    %104 = arith.select %39, %85, %103 : vector<16x16xi1>, vector<16x16xf32>
    %cst_34 = arith.constant dense<0xFF800000> : vector<16xf32>
    %105 = vector.multi_reduction <maximumf>, %104, %cst_34 [1] : vector<16x16xf32> to vector<16xf32>
    %106 = vector.shape_cast %105 : vector<16xf32> to vector<16x1xf32>
    %107 = vector.broadcast %106 : vector<16x1xf32> to vector<16x16xf32>
    %108 = arith.subf %104, %107 : vector<16x16xf32>
    %109 = math.exp %108 : vector<16x16xf32>
    %cst_35 = arith.constant dense<0.000000e+00> : vector<16xf32>
    %110 = vector.multi_reduction <add>, %109, %cst_35 [1] : vector<16x16xf32> to vector<16xf32>
    %111 = vector.shape_cast %110 : vector<16xf32> to vector<16x1xf32>
    %112 = arith.truncf %109 : vector<16x16xf32> to vector<16x16xbf16>
    %cst_36 = arith.constant dense<0.000000e+00> : vector<16x8xf32>
    %113 = tpu.matmul %112, %82, %cst_36 {dimension_numbers = #tpu.dot_dimension_numbers<[1], [0], [0], [1], [0, 0, 1, 1], [], []>} : vector<16x16xbf16>, vector<16x8xbf16>, vector<16x8xf32> -> vector<16x8xf32>
    %114 = tpu.reciprocal %111 {approx = true} : vector<16x1xf32> -> vector<16x1xf32>
    %115 = vector.broadcast %114 : vector<16x1xf32> to vector<16x8xf32>
    %116 = arith.mulf %113, %115 : vector<16x8xf32>
    %117 = arith.addf %102, %116 : vector<16x8xf32>
    %118 = vector.extract_strided_slice %32 {offsets = [0, 16], sizes = [16, 8], strides = [1, 1]} : vector<16x96xf32> to vector<16x8xf32>
    %119 = vector.extract_strided_slice %32 {offsets = [0, 48], sizes = [16, 8], strides = [1, 1]} : vector<16x96xf32> to vector<16x8xf32>
    %120 = vector.extract_strided_slice %32 {offsets = [0, 80], sizes = [16, 8], strides = [1, 1]} : vector<16x96xf32> to vector<16x8xf32>
    %121 = arith.truncf %120 : vector<16x8xf32> to vector<16x8xbf16>
    %122 = arith.truncf %118 : vector<16x8xf32> to vector<16x8xbf16>
    %123 = arith.truncf %119 : vector<16x8xf32> to vector<16x8xbf16>
    %cst_37 = arith.constant dense<0.000000e+00> : vector<16x16xf32>
    %124 = tpu.matmul %122, %123, %cst_37 {dimension_numbers = #tpu.dot_dimension_numbers<[1], [1], [0], [0], [0, 0, 1, 0], [], []>} : vector<16x8xbf16>, vector<16x8xbf16>, vector<16x16xf32> -> vector<16x16xf32>
    %cst_38 = arith.constant 1.000000e+00 : f32
    %125 = vector.broadcast %cst_38 : f32 to vector<16x16xf32>
    %126 = arith.addf %125, %124 : vector<16x16xf32>
    %cst_39 = arith.constant 5.000000e-01 : f32
    %127 = vector.broadcast %cst_39 : f32 to vector<16x16xf32>
    %128 = arith.mulf %127, %124 : vector<16x16xf32>
    %129 = arith.mulf %128, %124 : vector<16x16xf32>
    %130 = arith.addf %126, %129 : vector<16x16xf32>
    %cst_40 = arith.constant 0.000000e+00 : f32
    %131 = vector.broadcast %cst_40 : f32 to vector<16x16xf32>
    %132 = arith.select %35, %130, %131 : vector<16x16xi1>, vector<16x16xf32>
    %133 = arith.truncf %132 : vector<16x16xf32> to vector<16x16xbf16>
    %cst_41 = arith.constant dense<0.000000e+00> : vector<16x8xf32>
    %134 = tpu.matmul %133, %121, %cst_41 {dimension_numbers = #tpu.dot_dimension_numbers<[1], [0], [0], [1], [0, 0, 1, 1], [], []>} : vector<16x16xbf16>, vector<16x8xbf16>, vector<16x8xf32> -> vector<16x8xf32>
    %cst_42 = arith.constant dense<0.000000e+00> : vector<16xf32>
    %135 = vector.multi_reduction <add>, %132, %cst_42 [1] : vector<16x16xf32> to vector<16xf32>
    %136 = vector.shape_cast %135 : vector<16xf32> to vector<16x1xf32>
    %cst_43 = arith.constant 9.99999993E-9 : f32
    %137 = vector.broadcast %cst_43 : f32 to vector<16x1xf32>
    %138 = arith.addf %136, %137 : vector<16x1xf32>
    %139 = tpu.reciprocal %138 {approx = true} : vector<16x1xf32> -> vector<16x1xf32>
    %140 = vector.broadcast %139 : vector<16x1xf32> to vector<16x8xf32>
    %141 = arith.mulf %134, %140 : vector<16x8xf32>
    %cst_44 = arith.constant 0xFF800000 : f32
    %142 = vector.broadcast %cst_44 : f32 to vector<16x16xf32>
    %143 = arith.select %39, %124, %142 : vector<16x16xi1>, vector<16x16xf32>
    %cst_45 = arith.constant dense<0xFF800000> : vector<16xf32>
    %144 = vector.multi_reduction <maximumf>, %143, %cst_45 [1] : vector<16x16xf32> to vector<16xf32>
    %145 = vector.shape_cast %144 : vector<16xf32> to vector<16x1xf32>
    %146 = vector.broadcast %145 : vector<16x1xf32> to vector<16x16xf32>
    %147 = arith.subf %143, %146 : vector<16x16xf32>
    %148 = math.exp %147 : vector<16x16xf32>
    %cst_46 = arith.constant dense<0.000000e+00> : vector<16xf32>
    %149 = vector.multi_reduction <add>, %148, %cst_46 [1] : vector<16x16xf32> to vector<16xf32>
    %150 = vector.shape_cast %149 : vector<16xf32> to vector<16x1xf32>
    %151 = arith.truncf %148 : vector<16x16xf32> to vector<16x16xbf16>
    %cst_47 = arith.constant dense<0.000000e+00> : vector<16x8xf32>
    %152 = tpu.matmul %151, %121, %cst_47 {dimension_numbers = #tpu.dot_dimension_numbers<[1], [0], [0], [1], [0, 0, 1, 1], [], []>} : vector<16x16xbf16>, vector<16x8xbf16>, vector<16x8xf32> -> vector<16x8xf32>
    %153 = tpu.reciprocal %150 {approx = true} : vector<16x1xf32> -> vector<16x1xf32>
    %154 = vector.broadcast %153 : vector<16x1xf32> to vector<16x8xf32>
    %155 = arith.mulf %152, %154 : vector<16x8xf32>
    %156 = arith.addf %141, %155 : vector<16x8xf32>
    %157 = vector.extract_strided_slice %32 {offsets = [0, 24], sizes = [16, 8], strides = [1, 1]} : vector<16x96xf32> to vector<16x8xf32>
    %158 = vector.extract_strided_slice %32 {offsets = [0, 56], sizes = [16, 8], strides = [1, 1]} : vector<16x96xf32> to vector<16x8xf32>
    %159 = vector.extract_strided_slice %32 {offsets = [0, 88], sizes = [16, 8], strides = [1, 1]} : vector<16x96xf32> to vector<16x8xf32>
    %160 = arith.truncf %159 : vector<16x8xf32> to vector<16x8xbf16>
    %161 = arith.truncf %157 : vector<16x8xf32> to vector<16x8xbf16>
    %162 = arith.truncf %158 : vector<16x8xf32> to vector<16x8xbf16>
    %cst_48 = arith.constant dense<0.000000e+00> : vector<16x16xf32>
    %163 = tpu.matmul %161, %162, %cst_48 {dimension_numbers = #tpu.dot_dimension_numbers<[1], [1], [0], [0], [0, 0, 1, 0], [], []>} : vector<16x8xbf16>, vector<16x8xbf16>, vector<16x16xf32> -> vector<16x16xf32>
    %cst_49 = arith.constant 1.000000e+00 : f32
    %164 = vector.broadcast %cst_49 : f32 to vector<16x16xf32>
    %165 = arith.addf %164, %163 : vector<16x16xf32>
    %cst_50 = arith.constant 5.000000e-01 : f32
    %166 = vector.broadcast %cst_50 : f32 to vector<16x16xf32>
    %167 = arith.mulf %166, %163 : vector<16x16xf32>
    %168 = arith.mulf %167, %163 : vector<16x16xf32>
    %169 = arith.addf %165, %168 : vector<16x16xf32>
    %cst_51 = arith.constant 0.000000e+00 : f32
    %170 = vector.broadcast %cst_51 : f32 to vector<16x16xf32>
    %171 = arith.select %35, %169, %170 : vector<16x16xi1>, vector<16x16xf32>
    %172 = arith.truncf %171 : vector<16x16xf32> to vector<16x16xbf16>
    %cst_52 = arith.constant dense<0.000000e+00> : vector<16x8xf32>
    %173 = tpu.matmul %172, %160, %cst_52 {dimension_numbers = #tpu.dot_dimension_numbers<[1], [0], [0], [1], [0, 0, 1, 1], [], []>} : vector<16x16xbf16>, vector<16x8xbf16>, vector<16x8xf32> -> vector<16x8xf32>
    %cst_53 = arith.constant dense<0.000000e+00> : vector<16xf32>
    %174 = vector.multi_reduction <add>, %171, %cst_53 [1] : vector<16x16xf32> to vector<16xf32>
    %175 = vector.shape_cast %174 : vector<16xf32> to vector<16x1xf32>
    %cst_54 = arith.constant 9.99999993E-9 : f32
    %176 = vector.broadcast %cst_54 : f32 to vector<16x1xf32>
    %177 = arith.addf %175, %176 : vector<16x1xf32>
    %178 = tpu.reciprocal %177 {approx = true} : vector<16x1xf32> -> vector<16x1xf32>
    %179 = vector.broadcast %178 : vector<16x1xf32> to vector<16x8xf32>
    %180 = arith.mulf %173, %179 : vector<16x8xf32>
    %cst_55 = arith.constant 0xFF800000 : f32
    %181 = vector.broadcast %cst_55 : f32 to vector<16x16xf32>
    %182 = arith.select %39, %163, %181 : vector<16x16xi1>, vector<16x16xf32>
    %cst_56 = arith.constant dense<0xFF800000> : vector<16xf32>
    %183 = vector.multi_reduction <maximumf>, %182, %cst_56 [1] : vector<16x16xf32> to vector<16xf32>
    %184 = vector.shape_cast %183 : vector<16xf32> to vector<16x1xf32>
    %185 = vector.broadcast %184 : vector<16x1xf32> to vector<16x16xf32>
    %186 = arith.subf %182, %185 : vector<16x16xf32>
    %187 = math.exp %186 : vector<16x16xf32>
    %cst_57 = arith.constant dense<0.000000e+00> : vector<16xf32>
    %188 = vector.multi_reduction <add>, %187, %cst_57 [1] : vector<16x16xf32> to vector<16xf32>
    %189 = vector.shape_cast %188 : vector<16xf32> to vector<16x1xf32>
    %190 = arith.truncf %187 : vector<16x16xf32> to vector<16x16xbf16>
    %cst_58 = arith.constant dense<0.000000e+00> : vector<16x8xf32>
    %191 = tpu.matmul %190, %160, %cst_58 {dimension_numbers = #tpu.dot_dimension_numbers<[1], [0], [0], [1], [0, 0, 1, 1], [], []>} : vector<16x16xbf16>, vector<16x8xbf16>, vector<16x8xf32> -> vector<16x8xf32>
    %192 = tpu.reciprocal %189 {approx = true} : vector<16x1xf32> -> vector<16x1xf32>
    %193 = vector.broadcast %192 : vector<16x1xf32> to vector<16x8xf32>
    %194 = arith.mulf %191, %193 : vector<16x8xf32>
    %195 = arith.addf %180, %194 : vector<16x8xf32>
    %196 = tpu.concatenate %78, %117, %156, %195 in 1 : vector<16x8xf32>, vector<16x8xf32>, vector<16x8xf32>, vector<16x8xf32> -> vector<16x32xf32>
    %197 = arith.addf %1, %196 : vector<16x32xf32>
    %c0_59 = arith.constant 0 : index
    %c0_60 = arith.constant 0 : index
    %198 = vector.load %arg6[%c0_59, %c0_60] : memref<1x32xf32, #tpu.memory_space<vmem>>, vector<1x32xf32>
    %c0_61 = arith.constant 0 : index
    %c0_62 = arith.constant 0 : index
    %199 = vector.load %arg7[%c0_61, %c0_62] : memref<1x32xf32, #tpu.memory_space<vmem>>, vector<1x32xf32>
    %cst_63 = arith.constant dense<0.000000e+00> : vector<16xf32>
    %200 = vector.multi_reduction <add>, %197, %cst_63 [1] : vector<16x32xf32> to vector<16xf32>
    %201 = vector.shape_cast %200 : vector<16xf32> to vector<16x1xf32>
    %cst_64 = arith.constant 3.200000e+01 : f32
    %202 = vector.broadcast %cst_64 : f32 to vector<16x1xf32>
    %203 = arith.divf %201, %202 : vector<16x1xf32>
    %204 = vector.broadcast %203 : vector<16x1xf32> to vector<16x32xf32>
    %205 = arith.subf %197, %204 : vector<16x32xf32>
    %206 = arith.mulf %205, %205 : vector<16x32xf32>
    %cst_65 = arith.constant dense<0.000000e+00> : vector<16xf32>
    %207 = vector.multi_reduction <add>, %206, %cst_65 [1] : vector<16x32xf32> to vector<16xf32>
    %208 = vector.shape_cast %207 : vector<16xf32> to vector<16x1xf32>
    %cst_66 = arith.constant 3.200000e+01 : f32
    %209 = vector.broadcast %cst_66 : f32 to vector<16x1xf32>
    %210 = arith.divf %208, %209 : vector<16x1xf32>
    %211 = vector.broadcast %203 : vector<16x1xf32> to vector<16x32xf32>
    %212 = arith.subf %197, %211 : vector<16x32xf32>
    %cst_67 = arith.constant 9.99999974E-6 : f32
    %213 = vector.broadcast %cst_67 : f32 to vector<16x1xf32>
    %214 = arith.addf %210, %213 : vector<16x1xf32>
    %215 = math.rsqrt %214 : vector<16x1xf32>
    %216 = vector.broadcast %215 : vector<16x1xf32> to vector<16x32xf32>
    %217 = arith.mulf %212, %216 : vector<16x32xf32>
    %218 = vector.broadcast %198 : vector<1x32xf32> to vector<16x32xf32>
    %219 = arith.mulf %217, %218 : vector<16x32xf32>
    %220 = vector.broadcast %199 : vector<1x32xf32> to vector<16x32xf32>
    %221 = arith.addf %219, %220 : vector<16x32xf32>
    %222 = arith.truncf %221 : vector<16x32xf32> to vector<16x32xbf16>
    %c0_68 = arith.constant 0 : index
    %c0_69 = arith.constant 0 : index
    %223 = vector.load %arg8[%c0_68, %c0_69] : memref<32x128xf32, #tpu.memory_space<vmem>>, vector<32x128xf32>
    %224 = arith.truncf %223 : vector<32x128xf32> to vector<32x128xbf16>
    %cst_70 = arith.constant dense<0.000000e+00> : vector<16x128xf32>
    %225 = tpu.matmul %222, %224, %cst_70 {dimension_numbers = #tpu.dot_dimension_numbers<[1], [0], [0], [1], [0, 0, 1, 1], [], []>} : vector<16x32xbf16>, vector<32x128xbf16>, vector<16x128xf32> -> vector<16x128xf32>
    %c0_71 = arith.constant 0 : index
    %c0_72 = arith.constant 0 : index
    %226 = vector.load %arg9[%c0_71, %c0_72] : memref<1x128xf32, #tpu.memory_space<vmem>>, vector<1x128xf32>
    %227 = vector.broadcast %226 : vector<1x128xf32> to vector<16x128xf32>
    %228 = arith.addf %225, %227 : vector<16x128xf32>
    %cst_73 = arith.constant 0.000000e+00 : f32
    %229 = vector.broadcast %cst_73 : f32 to vector<16x128xf32>
    %230 = arith.maximumf %228, %229 : vector<16x128xf32>
    %231 = arith.truncf %230 : vector<16x128xf32> to vector<16x128xbf16>
    %c0_74 = arith.constant 0 : index
    %c0_75 = arith.constant 0 : index
    %232 = vector.load %arg10[%c0_74, %c0_75] : memref<128x32xf32, #tpu.memory_space<vmem>>, vector<128x32xf32>
    %233 = arith.truncf %232 : vector<128x32xf32> to vector<128x32xbf16>
    %cst_76 = arith.constant dense<0.000000e+00> : vector<16x32xf32>
    %234 = tpu.matmul %231, %233, %cst_76 {dimension_numbers = #tpu.dot_dimension_numbers<[1], [0], [0], [1], [0, 0, 1, 1], [], []>} : vector<16x128xbf16>, vector<128x32xbf16>, vector<16x32xf32> -> vector<16x32xf32>
    %c0_77 = arith.constant 0 : index
    %c0_78 = arith.constant 0 : index
    %235 = vector.load %arg11[%c0_77, %c0_78] : memref<1x32xf32, #tpu.memory_space<vmem>>, vector<1x32xf32>
    %236 = vector.broadcast %235 : vector<1x32xf32> to vector<16x32xf32>
    %237 = arith.addf %234, %236 : vector<16x32xf32>
    %238 = arith.addf %197, %237 : vector<16x32xf32>
    %c0_79 = arith.constant 0 : index
    %c0_80 = arith.constant 0 : index
    %c0_81 = arith.constant 0 : index
    %239 = vector.load %arg12[%c0_79, %c0_80, %c0_81] : memref<1x16x32xf32, #tpu.memory_space<vmem>>, vector<1x16x32xf32>
    %240 = vector.shape_cast %239 : vector<1x16x32xf32> to vector<16x32xf32>
    %241 = vector.shape_cast %238 : vector<16x32xf32> to vector<1x16x32xf32>
    tpu.vector_store %arg12[%c0_79, %c0_80, %c0_81], %241 {strides = array<i32>} : memref<1x16x32xf32, #tpu.memory_space<vmem>>, vector<1x16x32xf32>,
    return
  }
  func.func @transform_0(%arg0: i32) -> (i32, i32, i32) {
    %c0_i32 = arith.constant 0 : i32
    %c0_i32_0 = arith.constant 0 : i32
    %c0_i32_1 = arith.constant 0 : i32
    return %arg0, %c0_i32, %c0_i32_0 : i32, i32, i32
  }
  func.func @transform_1(%arg0: i32) -> (i32, i32) {
    %c0_i32 = arith.constant 0 : i32
    %c0_i32_0 = arith.constant 0 : i32
    %c0_i32_1 = arith.constant 0 : i32
    return %c0_i32, %c0_i32_0 : i32, i32
  }
  func.func @transform_2(%arg0: i32) -> (i32, i32) {
    %c0_i32 = arith.constant 0 : i32
    %c0_i32_0 = arith.constant 0 : i32
    %c0_i32_1 = arith.constant 0 : i32
    return %c0_i32, %c0_i32_0 : i32, i32
  }
  func.func @transform_3(%arg0: i32) -> (i32, i32) {
    %c0_i32 = arith.constant 0 : i32
    %c0_i32_0 = arith.constant 0 : i32
    %c0_i32_1 = arith.constant 0 : i32
    return %c0_i32, %c0_i32_0 : i32, i32
  }
  func.func @transform_4(%arg0: i32) -> (i32, i32) {
    %c0_i32 = arith.constant 0 : i32
    %c0_i32_0 = arith.constant 0 : i32
    %c0_i32_1 = arith.constant 0 : i32
    return %c0_i32, %c0_i32_0 : i32, i32
  }
  func.func @transform_5(%arg0: i32) -> (i32, i32) {
    %c0_i32 = arith.constant 0 : i32
    %c0_i32_0 = arith.constant 0 : i32
    %c0_i32_1 = arith.constant 0 : i32
    return %c0_i32, %c0_i32_0 : i32, i32
  }
  func.func @transform_6(%arg0: i32) -> (i32, i32) {
    %c0_i32 = arith.constant 0 : i32
    %c0_i32_0 = arith.constant 0 : i32
    %c0_i32_1 = arith.constant 0 : i32
    return %c0_i32, %c0_i32_0 : i32, i32
  }
  func.func @transform_7(%arg0: i32) -> (i32, i32) {
    %c0_i32 = arith.constant 0 : i32
    %c0_i32_0 = arith.constant 0 : i32
    %c0_i32_1 = arith.constant 0 : i32
    return %c0_i32, %c0_i32_0 : i32, i32
  }
  func.func @transform_8(%arg0: i32) -> (i32, i32) {
    %c0_i32 = arith.constant 0 : i32
    %c0_i32_0 = arith.constant 0 : i32
    %c0_i32_1 = arith.constant 0 : i32
    return %c0_i32, %c0_i32_0 : i32, i32
  }
  func.func @transform_9(%arg0: i32) -> (i32, i32) {
    %c0_i32 = arith.constant 0 : i32
    %c0_i32_0 = arith.constant 0 : i32
    %c0_i32_1 = arith.constant 0 : i32
    return %c0_i32, %c0_i32_0 : i32, i32
  }
  func.func @transform_10(%arg0: i32) -> (i32, i32) {
    %c0_i32 = arith.constant 0 : i32
    %c0_i32_0 = arith.constant 0 : i32
    %c0_i32_1 = arith.constant 0 : i32
    return %c0_i32, %c0_i32_0 : i32, i32
  }
  func.func @transform_11(%arg0: i32) -> (i32, i32, i32) {
    %c0_i32 = arith.constant 0 : i32
    %c0_i32_0 = arith.constant 0 : i32
    %c0_i32_1 = arith.constant 0 : i32
    return %arg0, %c0_i32, %c0_i32_0 : i32, i32, i32
  }
}

</mosaic_0001>

<bundles_post_ra>
// kernel: transformer_forward.5
= control target key start
LH: loop header
LB: loop body
LE: loop exit
PB: predicated region body
PF: predicated region fallthrough
CT: control target
= control target key end

     0   :  { %vm26_vm0 = vcmask 261120   ;;  %s322_s0 = inlined_call_operand.vmem [shape: f32[32,32], index: 0, kind: input, shape index: {}]   ;;  %s323_s1 = inlined_call_operand.vmem [shape: f32[1,32], index: 1, kind: input, shape index: {}]   ;;  %s324_s2 = inlined_call_operand.vmem [shape: f32[1,32], index: 2, kind: input, shape index: {}]   ;;  %s325_s3 = inlined_call_operand.vmem [shape: f32[32,50], index: 3, kind: input, shape index: {}]   ;;  %s326_s4 = inlined_call_operand.vmem [shape: f32[1,50], index: 4, kind: input, shape index: {}]   ;;  %s327_s5 = inlined_call_operand.hbm [shape: f32[32,50], index: 5, kind: output, shape index: {}]  }
   0x1   :  { %v22_v0 = vld [vmem:[%s322_s0] sm:$0xff]  ;;  %v24_v1 = vld [vmem:[%s322_s0 + $0x10] sm:$0xff]  ;;  %v23_v2 = vld [vmem:[%s322_s0 + $0x8] sm:$0xff] }
   0x2   :  { %v27_v3 = vsel %vm26_vm0, %v22_v0, 0.0  ;;  %v33_v4 = vsel %vm26_vm0, %v24_v1, 0.0  ;;  %v25_v5 = vld [vmem:[%s322_s0 + $0x18] sm:$0xff] }
   0x3   :  { %10 = vsyncpa [#allocation3], 0  ;;  %28 = vadd.xlane.f32.xlu0 %v27_v3  ;;  %34 = vadd.xlane.f32.xlu1 %v33_v4  ;;  %v30_v6 = vsel %vm26_vm0, %v23_v2, 0.0  ;;  %v36_v7 = vsel %vm26_vm0, %v25_v5, 0.0  ;;  %v106_v28 = vld [vmem:[%s325_s3 + $0x10] sm:$0xff]  ;;  %v107_v29 = vld [vmem:[%s325_s3 + $0x18] sm:$0xff] }
   0x4   :  { %v104_v30 = vld [vmem:[%s325_s3] sm:$0xff]  ;;  %v109_v31 = vpack.c.bf16 %v107_v29, %v106_v28  ;;  %v105_v32 = vld [vmem:[%s325_s3 + $0x8] sm:$0xff]  ;;  %vm172_vm1 = vcmask 408576  }
   0x5   :  { %v108_v33 = vpack.c.bf16 %v105_v32, %v104_v30  ;;  %v193_v48 = vld [vmem:[%s323_s1] ss:$0 sm:$0xff] }
   0x6   :  { %202 = vmatprep.subr.bf16.mxu0 %v109_v31  ;;  %v194_v53 = vld [vmem:[%s324_s2] ss:$0 sm:$0xff]  ;;  %s243_s2 = smov [#allocation2]  }
   0x7   :  { %31 = vadd.xlane.f32.xlu0 %v30_v6  ;;  %37 = vadd.xlane.f32.xlu1 %v36_v7  ;;  %s182_s12 = sshll.u32 %s243_s2, 4  ;;  %s183_s12 = int_to_ptr.vmem [resolvable:$true] %s182_s12 }
   0x8   :  { %203 = vmatpush3.bf16.msra.mxu0 %v109_v31  ;;  %s221_s13 = scalar_lea.vmem %s183_s12, 512  ;;  %p226_p1 = scmp.lt.s32.totalorder %s183_s12, %s183_s12 }
   0x9   :  { %204 = vmatprep.subr.bf16.mxu0 %v108_v33  ;;  %p222_p0 = scmp.ne.s32.totalorder %s183_s12, %s221_s13  ;;  %p227_p2 = scmp.lt.s32.totalorder %s221_s13, %s221_s13 }
   0xb   :  { %p228_p3 = por %p227_p2, %p226_p1 }
   0xc   :  { %205 = vmatpush3.bf16.msra.mxu0 %v108_v33 }
   0xd   :  { %p229_p4 = pnand %p228_p3, %p222_p0 }
  0x8c   :  { %v29_v8 = vpop.xlane.xlu0 %28  ;;  %v35_v9 = vpop.xlane.xlu1 %34 }
  0x8d   :  { %v40_v10 = vmul.f32 0.03125, %v29_v8  ;;  %v42_v11 = vmul.f32 0.03125, %v35_v9 }
  0x8f   :  { %v44_v12 = vsub.f32 %v22_v0, %v40_v10  ;;  %v46_v13 = vsub.f32 %v24_v1, %v42_v11 }
  0x90   :  { %v32_v14 = vpop.xlane.xlu0 %31  ;;  %v38_v15 = vpop.xlane.xlu1 %37 }
  0x91   :  { %v41_v16 = vmul.f32 0.03125, %v32_v14  ;;  %v43_v17 = vmul.f32 0.03125, %v38_v15  ;;  %v48_v18 = vmul.f32 %v44_v12, %v44_v12  ;;  %v50_v19 = vmul.f32 %v46_v13, %v46_v13 }
  0x93   :  { %v45_v20 = vsub.f32 %v23_v2, %v41_v16  ;;  %v47_v21 = vsub.f32 %v25_v5, %v43_v17  ;;  %v52_v22 = vsel %vm26_vm0, %v48_v18, 0.0  ;;  %v58_v23 = vsel %vm26_vm0, %v50_v19, 0.0  ;;  %v195_v2 = vld [vmem:[%s326_s4] ss:$0 sm:$0xff] }
  0x94   :  { %53 = vadd.xlane.f32.xlu0 %v52_v22 }
  0x95   :  { %v49_v24 = vmul.f32 %v45_v20, %v45_v20  ;;  %v51_v25 = vmul.f32 %v47_v21, %v47_v21 }
  0x97   :  { %v55_v26 = vsel %vm26_vm0, %v49_v24, 0.0  ;;  %v61_v27 = vsel %vm26_vm0, %v51_v25, 0.0 }
  0x98   :  { %59 = vadd.xlane.f32.xlu0 %v58_v23  ;;  %56 = vadd.xlane.f32.xlu1 %v55_v26 }
  0x9c   :  { %62 = vadd.xlane.f32.xlu1 %v61_v27 }
 0x11d   :  { %v54_v34 = vpop.xlane.xlu0 %53 }
 0x11e   :  { %v64_v35 = vmul.f32 0.03125, %v54_v34 }
 0x120   :  { %v68_v36 = vadd.f32 1e-05, %v64_v35 }
 0x121   :  { %v57_v37 = vpop.xlane.xlu1 %56  ;;  %v60_v38 = vpop.xlane.xlu0 %59 }
 0x122   :  { %213 = vrsqrt.f32 %v68_v36  ;;  %v65_v39 = vmul.f32 0.03125, %v57_v37  ;;  %v66_v40 = vmul.f32 0.03125, %v60_v38 }
 0x124   :  { %v69_v41 = vadd.f32 1e-05, %v65_v39  ;;  %v70_v42 = vadd.f32 1e-05, %v66_v40 }
 0x125   :  { %v63_v43 = vpop.xlane.xlu1 %62 }
 0x126   :  { %215 = vrsqrt.f32 %v69_v41  ;;  %v67_v44 = vmul.f32 0.03125, %v63_v43 }
 0x127   :  { %217 = vrsqrt.f32 %v70_v42 }
 0x128   :  { %v71_v45 = vadd.f32 1e-05, %v67_v44 }
 0x12a   :  { %219 = vrsqrt.f32 %v71_v45 }
 0x12f   :  { %v214_v46 = vpop.eup %213 }
 0x130   :  { %v76_v47 = vmul.f32 %v214_v46, %v44_v12 }
 0x132   :  { %v87_v52 = vmul.f32 %v193_v48, %v76_v47 }
 0x133   :  { %v216_v49 = vpop.eup %215 }
 0x134   :  { %v218_v50 = vpop.eup %217  ;;  %v77_v51 = vmul.f32 %v216_v49, %v45_v20  ;;  %v98_v57 = vadd.f32 %v194_v53, %v87_v52 }
 0x135   :  { %v78_v54 = vmul.f32 %v218_v50, %v46_v13 }
 0x136   :  { %v88_v55 = vmul.f32 %v193_v48, %v77_v51 }
 0x137   :  { %v220_v56 = vpop.eup %219  ;;  %v89_v60 = vmul.f32 %v193_v48, %v78_v54 }
 0x138   :  { %v99_v58 = vadd.f32 %v194_v53, %v88_v55  ;;  %v79_v59 = vmul.f32 %v220_v56, %v47_v21 }
 0x139   :  { %v100_v63 = vadd.f32 %v194_v53, %v89_v60 }
 0x13a   :  { %v102_v61 = vpack.c.bf16 %v99_v58, %v98_v57  ;;  %v90_v62 = vmul.f32 %v193_v48, %v79_v59 }
 0x13c   :  { %206 = vmatprep.mubr.msk.bf16.mxu0 %vm26_vm0, %v102_v61  ;;  %v101_v0 = vadd.f32 %v194_v53, %v90_v62 }
 0x13e   :  { %v103_v1 = vpack.c.bf16 %v101_v0, %v100_v63 }
 0x140   :  { %207 = vmatmul.mubr.msk.bf16.vlgmr.msra.gmra.mxu0 %vm26_vm0, %v103_v1 }
 0x200   :  { %v208_v3 = vpop.f32.mrf.mxu0 }
 0x201   :  { %v166_v4 = vadd.f32 %v208_v3, %v195_v2 }
 0x202   :  { %v157_v5 = vpop.f32.mrf.mxu0 }
 0x203   :  { %175 = vst.msk [vmem:[#allocation2 + $0x10] sm:$0xff] %vm172_vm1, %v166_v4  ;;  %v158_v6 = vadd.f32 %v195_v2, %v157_v5 }
 0x204   :  { %v209_v7 = vpop.f32.mrf.mxu0 }
 0x205   :  { %173 = vst.msk [vmem:[#allocation2] sm:$0xff] %vm172_vm1, %v158_v6  ;;  %v169_v8 = vadd.f32 %v209_v7, %v195_v2 }
 0x206   :  { %v160_v9 = vpop.f32.mrf.mxu0 }
 0x207   :  { %176 = vst.msk [vmem:[#allocation2 + $0x18] sm:$0xff] %vm172_vm1, %v169_v8  ;;  %v161_v10 = vadd.f32 %v195_v2, %v160_v9 }
 0x209   :  { %174 = vst.msk [vmem:[#allocation2 + $0x8] sm:$0xff] %vm172_vm1, %v161_v10 }
 0x20a   :  { %232 = shalt.err (!%p229_p4)
}
 0x20b   :  { %s244_s4 = smov 128   ;;  %s245_s14 = smov 8  }
 0x20c   :  { %188 = dma.vmem_to_hbm [thread:$0]  %s183_s12, 512, %s327_s5, [#allocation3], %s244_s4, %s244_s4, %s245_s14  }
 0x20d   :  { %241 = dma.done.wait [#allocation3], 512  }
 0x20e   :  { %242 = vsyncadd [#allocation3], 4294966784 }
 0x20f   :  { %192 = vsyncpa [#allocation3], 1 }

// kernel: transformer_forward.3
= control target key start
LH: loop header
LB: loop body
LE: loop exit
PB: predicated region body
PF: predicated region fallthrough
CT: control target
= control target key end

     0   :  { %s1891_s17 = smov 0   ;;  %s2254_s0 = inlined_call_operand.vmem [shape: f32[2,16,32], index: 0, kind: input, shape index: {}]   ;;  %s2255_s1 = inlined_call_operand.vmem [shape: f32[1,32], index: 1, kind: input, shape index: {}]   ;;  %s2256_s2 = inlined_call_operand.vmem [shape: f32[1,32], index: 2, kind: input, shape index: {}]   ;;  %s2257_s3 = inlined_call_operand.vmem [shape: f32[32,96], index: 3, kind: input, shape index: {}]   ;;  %s2258_s4 = inlined_call_operand.vmem [shape: f32[1,96], index: 4, kind: input, shape index: {}]   ;;  %s2259_s5 = inlined_call_operand.vmem [shape: f32[1,32], index: 5, kind: input, shape index: {}]   ;;  %s2260_s6 = inlined_call_operand.vmem [shape: f32[1,32], index: 6, kind: input, shape index: {}]   ;;  %s2261_s7 = inlined_call_operand.vmem [shape: f32[32,128], index: 7, kind: input, shape index: {}]   ;;  %s2262_s8 = inlined_call_operand.vmem [shape: f32[1,128], index: 8, kind: input, shape index: {}]   ;;  %s2263_s9 = inlined_call_operand.vmem [shape: f32[128,32], index: 9, kind: input, shape index: {}]   ;;  %s2264_s10 = inlined_call_operand.vmem [shape: f32[1,32], index: 10, kind: input, shape index: {}]   ;;  %s2265_s11 = inlined_call_operand.vmem [shape: f32[2,16,32], index: 11, kind: output, shape index: {}]  }
   0x1 LB: > { %s1545_s18 = sadd.s32 4294967295, %s1813_s17   ;;  %p1549_p0 = scmp.ge.s32.totalorder %s1813_s17, 1  ;;  %s1813_s17 = sphi %s1891_s17, %s21_s17  }
   0x2   : > { %p337_p1 = scmp.lt.s32.totalorder %s1813_s17, 3 }
   0x4   : > { %p338_p2 = pnand %p1549_p0, %p337_p1 }
   0x5   : > { %p377_p3 = scmp.lt.s32.totalorder (!%p338_p2), %s1545_s18, 1  ;;  %s1817_s21 = smov (!%p338_p2), 88  }
   0x6   : > { %341 = sbr.rel (%p338_p2) target bundleno = 2631 (0xa47), region = 64  ;;  %s1819_s23 = smov (!%p338_p2), 120  }
   0x7   : > { %s1820_s24 = smov (!%p338_p2), 56   ;;  %s1821_s25 = smov (!%p338_p2), 80  }
   0x8   : > { %s1822_s26 = smov (!%p338_p2), 64   ;;  %s1823_s27 = smov (!%p338_p2), 112  }
   0x9   : > { %s1824_s28 = smov (!%p338_p2), 72   ;;  %s1825_s29 = smov (!%p338_p2), 104  }
   0xa   : > { %s1826_s30 = smov (!%p338_p2), 48   ;;  %s1827_s12 = smov (!%p338_p2), 40  }
   0xb   : > { %s2273_s18 = smov (!%p377_p3, %s1545_s18), 1  ;;  %vm392_vm0 = vcmask 261120   ;;  %v439_v14 = vld [vmem:[%s2257_s3 + $0x10] sm:$0xff]  ;;  %v440_v15 = vld [vmem:[%s2257_s3 + $0x18] sm:$0xff]  ;;  %v437_v16 = vld [vmem:[%s2257_s3] sm:$0xff]  ;;  %v1815_v17 = vmov 0.0   ;;  %v494_v51 = vlaneseq }
   0xc   : > { %s1578_s19 = sshll.u32 %s2273_s18, 4  ;;  %1619 = vmatprep.subr.bf16.mxu1 %v1815_v17  ;;  %v442_v18 = vpack.c.bf16 %v440_v15, %v439_v14  ;;  %v438_v19 = vld [vmem:[%s2257_s3 + $0x8] sm:$0xff]  ;;  %vm1816_vm1 = vmmov 0   ;;  %1645 = vmatprep.subr.bf16.mxu0 %v1815_v17  ;;  %v1554_v29 = vld [vmem:[%s2255_s1] ss:$0 sm:$0xff]  ;;  %vm510_vm2 = vcmask 64512  }
   0xd   : > { %s381_s22 = scalar_lea.vmem %s2254_s0, %s1578_s19  ;;  %1623 = vmatprep.mubr.msk.bf16.mxu1 %vm1816_vm1, %v1815_v17  ;;  %1647 = vmatprep.mubr.msk.bf16.mxu0 %vm1816_vm1, %v1815_v17  ;;  %v441_v20 = vpack.c.bf16 %v438_v19, %v437_v16  ;;  %v1555_v33 = vld [vmem:[%s2256_s2] ss:$0 sm:$0xff]  ;;  %v495_v52 = vshrl.u32 %v494_v51, 7  ;;  %v498_v53 = vand.u32 127, %v494_v51  ;;  %vm572_vm4 = vcmask 130048   ;;  %s1828_s13 = smov 8  }
   0xe   : > { %v1907_v0 = vld [vmem:[%s381_s22] sm:$0xff]  ;;  %v1909_v1 = vld [vmem:[%s381_s22 + $0x8] sm:$0xff]  ;;  %1620 = vmatpush3.bf16.msra.mxu1 %v442_v18  ;;  %s1818_s22 = smov 96   ;;  %s1829_s14 = smov 16   ;;  %vm1304_vm8 = vcmask 195584  }
   0xf   : > { %v393_v2 = vsel %vm392_vm0, %v1907_v0, 0.0  ;;  %v396_v3 = vsel %vm392_vm0, %v1909_v1, 0.0  ;;  %1621 = vmatprep.subr.bf16.mxu1 %v1815_v17  ;;  %v1556_v39 = vld [vmem:[%s2258_s4] ss:$0 sm:$0xff]  ;;  %v496_v54 = vadd.s32 8, %v495_v52  ;;  %vm1967_vm3 = vcmp.le.s32.totalorder %v498_v53, %v495_v52  ;;  %s1830_s15 = smov 24  }
  0x10   : > { %394 = vadd.xlane.f32.xlu0 %v393_v2  ;;  %vm503_vm6 = vcmp.gt.s32.totalorder %v498_v53, %v495_v52 }
  0x11   : > { %vm1971_vm5 = vcmp.le.s32.totalorder %v498_v53, %v496_v54 }
  0x12   : > { %1622 = vmatpush3.bf16.msra.mxu1 %v441_v20  ;;  %vm1980_vm7 = vmand %vm1971_vm5, %vm503_vm6 }
  0x13   : > { %1627 = vmatprep.subr.bf16.mxu1 %v1815_v17 }
  0x14   : > { %397 = vadd.xlane.f32.xlu0 %v396_v3 }
  0x99   : > { %v395_v4 = vpop.xlane.xlu0 %394 }
  0x9a   : > { %v400_v5 = vmul.f32 0.03125, %v395_v4 }
  0x9c   : > { %v402_v6 = vsub.f32 %v1907_v0, %v400_v5 }
  0x9d   : > { %v398_v7 = vpop.xlane.xlu0 %397 }
  0x9e   : > { %v401_v8 = vmul.f32 0.03125, %v398_v7  ;;  %v404_v9 = vmul.f32 %v402_v6, %v402_v6 }
  0xa0   : > { %v403_v10 = vsub.f32 %v1909_v1, %v401_v8  ;;  %v406_v11 = vsel %vm392_vm0, %v404_v9, 0.0 }
  0xa1   : > { %407 = vadd.xlane.f32.xlu1 %v406_v11 }
  0xa2   : > { %v405_v12 = vmul.f32 %v403_v10, %v403_v10 }
  0xa4   : > { %v409_v13 = vsel %vm392_vm0, %v405_v12, 0.0 }
  0xa5   : > { %410 = vadd.xlane.f32.xlu1 %v409_v13 }
 0x12a   : > { %v408_v21 = vpop.xlane.xlu1 %407 }
 0x12b   : > { %v412_v22 = vmul.f32 0.03125, %v408_v21 }
 0x12d   : > { %v414_v23 = vadd.f32 1e-05, %v412_v22 }
 0x12e   : > { %v411_v24 = vpop.xlane.xlu1 %410 }
 0x12f   : > { %1751 = vrsqrt.f32 %v414_v23  ;;  %v413_v25 = vmul.f32 0.03125, %v411_v24 }
 0x131   : > { %v415_v26 = vadd.f32 1e-05, %v413_v25 }
 0x133   : > { %1753 = vrsqrt.f32 %v415_v26 }
 0x13c   : > { %v1752_v27 = vpop.eup %1751 }
 0x13d   : > { %v418_v28 = vmul.f32 %v1752_v27, %v402_v6 }
 0x13f   : > { %v426_v32 = vmul.f32 %v1554_v29, %v418_v28 }
 0x140   : > { %v1754_v30 = vpop.eup %1753 }
 0x141   : > { %v419_v31 = vmul.f32 %v1754_v30, %v403_v10  ;;  %v434_v35 = vadd.f32 %v1555_v33, %v426_v32 }
 0x143   : > { %v427_v34 = vmul.f32 %v1554_v29, %v419_v31 }
 0x145   : > { %v435_v36 = vadd.f32 %v1555_v33, %v427_v34 }
 0x147   : > { %v436_v37 = vpack.c.bf16 %v435_v36, %v434_v35 }
 0x149   : > { %1624 = vmatmul.mubr.msk.bf16.vlgmr.msra.gmra.mxu1 %vm392_vm0, %v436_v37 }
 0x14a   : > { %1629 = vmatprep.mubr.msk.bf16.mxu1 %vm1816_vm1, %v1815_v17 }
 0x209   : > { %v487_v38 = vpop.f32.mrf.mxu1 }
 0x20a   : > { %v488_v42 = vadd.f32 %v1556_v39, %v487_v38 }
 0x20b   : > { %v1625_v40 = vpop.f32.mrf.mxu1 }
 0x20d   : > { %v490_v41 = vpop.f32.mrf.mxu1 }
 0x20e   : > { %v491_v43 = vadd.f32 %v1556_v39, %v490_v41 }
 0x20f   : > { %v1626_v44 = vpop.f32.mrf.mxu1 }
 0x210   : > { %v1951_v45 = vpack.c.bf16 %v491_v43, %v488_v42 }
 0x212   : > { %702 = vrot.lane.b32.xlu1 %v1951_v45, %s1817_s21  ;;  %508 = vrot.lane.b32.xlu0 %v1951_v45, %s1818_s22  ;;  %s386_s21 = scalar_lea.vmem %s2265_s11, %s1578_s19 }
 0x216   : > { %700 = vrot.lane.b32.xlu1 %v1951_v45, %s1819_s23 }
 0x284   : > { %v703_v46 = vpop.permute.xlu1 %702  ;;  %v509_v47 = vpop.permute.xlu0 %508 }
 0x285   : > { %v515_v48 = vsel %vm510_vm2, %v509_v47, 0  ;;  %v708_v49 = vsel %vm510_vm2, %v703_v46, 0 }
 0x286   : > { %1628 = vmatpush3.bf16.xpose.msra.mxu1 %v515_v48  ;;  %1646 = vmatpush3.bf16.xpose.msra.mxu0 %v708_v49 }
 0x287   : > { %1657 = vmatprep.subr.bf16.mxu0 %v1815_v17  ;;  %1633 = vmatprep.subr.bf16.mxu1 %v1815_v17 }
 0x288   : > { %v701_v50 = vpop.permute.xlu1 %700 }
 0x28d   : > { %1630 = vmatmul.mubr.msk.bf16.vlgmr.msra.gmra.mxu1 %vm510_vm2, %v1951_v45  ;;  %1648 = vmatmul.mubr.msk.bf16.vlgmr.msra.gmra.mxu0 %vm510_vm2, %v701_v50 }
 0x28e   : > { %1635 = vmatprep.mubr.msk.bf16.mxu1 %vm1816_vm1, %v1815_v17  ;;  %1659 = vmatprep.mubr.msk.bf16.mxu0 %vm1816_vm1, %v1815_v17 }
 0x34d   : > { %v551_v56 = vpop.f32.mrf.mxu1  ;;  %v744_v57 = vpop.f32.mrf.mxu0 }
 0x34e   : > { %v560_v59 = vmul.f32 0.5, %v551_v56  ;;  %v753_v60 = vmul.f32 0.5, %v744_v57  ;;  %v629_v63 = vsel %vm1967_vm3, %v551_v56, -inf  ;;  %v558_v8 = vadd.f32 1.0, %v551_v56 }
 0x34f   : > { %v1631_v61 = vpop.f32.mrf.mxu1  ;;  %v1649_v62 = vpop.f32.mrf.mxu0  ;;  %v631_v3 = vsel %vm572_vm4, %v629_v63, -inf  ;;  %v751_v10 = vadd.f32 1.0, %v744_v57  ;;  %v821_v31 = vsel %vm1967_vm3, %v744_v57, -inf }
 0x350   : > { %v562_v2 = vmul.f32 %v560_v59, %v551_v56  ;;  %v755_v5 = vmul.f32 %v753_v60, %v744_v57  ;;  %632 = vmax.xlane.f32.xlu1 %v631_v3  ;;  %v823_v32 = vsel %vm572_vm4, %v821_v31, -inf }
 0x351   : > { %v554_v6 = vpop.f32.mrf.mxu1  ;;  %v747_v7 = vpop.f32.mrf.mxu0 }
 0x352   : > { %v561_v9 = vmul.f32 0.5, %v554_v6  ;;  %v754_v11 = vmul.f32 0.5, %v747_v7  ;;  %v630_v14 = vsel %vm1980_vm7, %v554_v6, -inf  ;;  %v564_v15 = vadd.f32 %v562_v2, %v558_v8 }
 0x353   : > { %v1632_v12 = vpop.f32.mrf.mxu1  ;;  %v1650_v13 = vpop.f32.mrf.mxu0  ;;  %v559_v16 = vadd.f32 1.0, %v554_v6  ;;  %v634_v19 = vsel %vm572_vm4, %v630_v14, -inf  ;;  %v757_v20 = vadd.f32 %v755_v5, %v751_v10  ;;  %v752_v21 = vadd.f32 1.0, %v747_v7 }
 0x354   : > { %v563_v18 = vmul.f32 %v561_v9, %v554_v6  ;;  %v756_v22 = vmul.f32 %v754_v11, %v747_v7  ;;  %635 = vmax.xlane.f32.xlu0 %v634_v19  ;;  %v1989_v25 = vsel %vm1967_vm3, %v564_v15, 0.0  ;;  %v822_v33 = vsel %vm1980_vm7, %v747_v7, -inf }
 0x355   : > { %v1997_v27 = vsel %vm1967_vm3, %v757_v20, 0.0  ;;  %v826_v34 = vsel %vm572_vm4, %v822_v33, -inf }
 0x356   : > { %v565_v23 = vadd.f32 %v563_v18, %v559_v16  ;;  %v758_v24 = vadd.f32 %v756_v22, %v752_v21 }
 0x358   : > { %v1993_v26 = vsel %vm1971_vm5, %v565_v23, 0.0  ;;  %v2003_v29 = vsel %vm1971_vm5, %v758_v24, 0.0 }
 0x359   : > { %v568_v28 = vpack.c.bf16 %v1993_v26, %v1989_v25  ;;  %v761_v30 = vpack.c.bf16 %v2003_v29, %v1997_v27 }
 0x361   : > { %762 = vrot.lane.b32.xlu1 %v1951_v45, %s1820_s24 }
 0x365   : > { %894 = vrot.lane.b32.xlu1 %v1951_v45, %s1821_s25 }
 0x36a   : > { %569 = vrot.lane.b32.xlu0 %v1951_v45, %s1822_s26 }
 0x36e   : > { %892 = vrot.lane.b32.xlu0 %v1951_v45, %s1823_s27 }
 0x389   : > { %824 = vmax.xlane.f32.xlu1 %v823_v32 }
 0x38d   : > { %827 = vmax.xlane.f32.xlu0 %v826_v34  ;;  %v809_v34 = vsel %vm572_vm4, %v1997_v27, 0.0 }
 0x39a   : > { %1086 = vrot.lane.b32.xlu1 %v1951_v45, %s1824_s28 }
 0x39e   : > { %1084 = vrot.lane.b32.xlu1 %v1951_v45, %s1825_s29 }
 0x3a3   : > { %954 = vrot.lane.b32.xlu0 %v1951_v45, %s1826_s30 }
 0x3d9   : > { %v633_v35 = vpop.xlane.xlu1 %632 }
 0x3da   : > { %v637_v36 = vsub.f32 %v629_v63, %v633_v35 }
 0x3dc   : > { %v639_v37 = vmul.f32 1.442695, %v637_v36 }
 0x3dd   : > { %v763_v38 = vpop.permute.xlu1 %762  ;;  %v636_v39 = vpop.xlane.xlu0 %635 }
 0x3de   : > { %v638_v40 = vsub.f32 %v630_v14, %v636_v39  ;;  %1658 = vmatpush3.bf16.msra.mxu0 %v763_v38  ;;  %1755 = vpow2.f32 %v639_v37 }
 0x3df   : > { %1669 = vmatprep.subr.bf16.mxu0 %v1815_v17 }
 0x3e0   : > { %v641_v41 = vmul.f32 1.442695, %v638_v40  ;;  %v812_v40 = vsel %vm572_vm4, %v2003_v29, 0.0 }
 0x3e1   : > { %v570_v42 = vpop.permute.xlu0 %569  ;;  %v895_v47 = vpop.permute.xlu1 %894 }
 0x3e2   : > { %1757 = vpow2.f32 %v641_v41  ;;  %1634 = vmatpush3.bf16.msra.mxu1 %v570_v42  ;;  %v900_v48 = vsel %vm510_vm2, %v895_v47, 0 }
 0x3e3   : > { %1639 = vmatprep.subr.bf16.mxu1 %v1815_v17 }
 0x3e5   : > { %1636 = vmatmul.mubr.msk.bf16.vlgmr.msra.gmra.mxu1 %vm572_vm4, %v568_v28  ;;  %v893_v49 = vpop.permute.xlu0 %892 }
 0x3e6   : > { %1640 = vmatpush3.bf16.msra.mxu1 %v570_v42  ;;  %1641 = vmatprep.mubr.msk.bf16.mxu1 %vm1816_vm1, %v1815_v17 }
 0x3e7   : > { %1651 = vmatprep.subr.bf16.mxu1 %v1815_v17 }
 0x3eb   : > { %v2026_v43 = vpop.eup %1755 }
 0x3ef   : > { %v2028_v44 = vpop.eup %1757 }
 0x3f0   : > { %v649_v46 = vpack.c.bf16 %v2028_v44, %v2026_v43 }
 0x3f2   : > { %1642 = vmatmul.mubr.msk.bf16.vlgmr.msra.gmra.mxu1 %vm572_vm4, %v649_v46 }
 0x3f3   : > { %1652 = vmatpush3.bf16.msra.mxu1 %v763_v38  ;;  %1653 = vmatprep.mubr.msk.bf16.mxu1 %vm1816_vm1, %v1815_v17 }
 0x3f4   : > { %1663 = vmatprep.subr.bf16.mxu1 %v1815_v17 }
 0x3fa   : > { %1654 = vmatmul.mubr.msk.bf16.vlgmr.msra.gmra.mxu1 %vm572_vm4, %v761_v30 }
 0x3fb   : > { %1664 = vmatpush3.bf16.xpose.msra.mxu1 %v900_v48  ;;  %1665 = vmatprep.mubr.msk.bf16.mxu1 %vm1816_vm1, %v1815_v17 }
 0x3fc   : > { %1675 = vmatprep.subr.bf16.mxu1 %v1815_v17 }
 0x402   : > { %1666 = vmatmul.mubr.msk.bf16.vlgmr.msra.gmra.mxu1 %vm510_vm2, %v893_v49 }
 0x403   : > { %1677 = vmatprep.mubr.msk.bf16.mxu1 %vm1816_vm1, %v1815_v17 }
 0x412   : > { %v825_v50 = vpop.xlane.xlu1 %824 }
 0x413   : > { %v829_v51 = vsub.f32 %v821_v31, %v825_v50 }
 0x415   : > { %v831_v52 = vmul.f32 1.442695, %v829_v51 }
 0x416   : > { %v828_v53 = vpop.xlane.xlu0 %827  ;;  %v1087_v35 = vpop.permute.xlu1 %1086 }
 0x417   : > { %v830_v54 = vsub.f32 %v822_v33, %v828_v53  ;;  %1759 = vpow2.f32 %v831_v52  ;;  %v1092_v39 = vsel %vm510_vm2, %v1087_v35, 0 }
 0x419   : > { %v833_v56 = vmul.f32 1.442695, %v830_v54 }
 0x41a   : > { %v955_v57 = vpop.permute.xlu0 %954  ;;  %v1085_v41 = vpop.permute.xlu1 %1084 }
 0x41b   : > { %1761 = vpow2.f32 %v833_v56  ;;  %1676 = vmatpush3.bf16.msra.mxu1 %v955_v57 }
 0x41c   : > { %1687 = vmatprep.subr.bf16.mxu1 %v1815_v17 }
 0x424   : > { %v1760_v59 = vpop.eup %1759 }
 0x425   : > { %v835_v29 = vsel %vm572_vm4, %v1760_v59, 0.0 }
 0x428   : > { %v1762_v60 = vpop.eup %1761 }
 0x429   : > { %v841_v61 = vpack.c.bf16 %v1762_v60, %v1760_v59  ;;  %v838_v46 = vsel %vm572_vm4, %v1762_v60, 0.0 }
 0x42b   : > { %1660 = vmatmul.mubr.msk.bf16.vlgmr.msra.gmra.mxu0 %vm572_vm4, %v841_v61 }
 0x42c   : > { %1670 = vmatpush3.bf16.msra.mxu0 %v955_v57  ;;  %1671 = vmatprep.mubr.msk.bf16.mxu0 %vm1816_vm1, %v1815_v17 }
 0x42d   : > { %1681 = vmatprep.subr.bf16.mxu0 %v1815_v17 }
 0x4a5   : > { %v2049_v62 = vpop.f32.mrf.mxu1 }
 0x4a7   : > { %v1637_v63 = vpop.f32.mrf.mxu1 }
 0x4a9   : > { %v2051_v2 = vpop.f32.mrf.mxu1 }
 0x4ab   : > { %v1638_v3 = vpop.f32.mrf.mxu1 }
 0x4b2   : > { %v2053_v5 = vpop.f32.mrf.mxu1 }
 0x4b4   : > { %v1643_v6 = vpop.f32.mrf.mxu1 }
 0x4b6   : > { %v2055_v7 = vpop.f32.mrf.mxu1 }
 0x4b8   : > { %v1644_v8 = vpop.f32.mrf.mxu1 }
 0x4ba   : > { %v2057_v9 = vpop.f32.mrf.mxu1 }
 0x4bc   : > { %v1655_v10 = vpop.f32.mrf.mxu1 }
 0x4be   : > { %v2059_v11 = vpop.f32.mrf.mxu1 }
 0x4c0   : > { %v1656_v12 = vpop.f32.mrf.mxu1 }
 0x4c2   : > { %v936_v13 = vpop.f32.mrf.mxu1 }
 0x4c3   : > { %v945_v14 = vmul.f32 0.5, %v936_v13  ;;  %v1013_v15 = vsel %vm1967_vm3, %v936_v13, -inf  ;;  %v943_v21 = vadd.f32 1.0, %v936_v13 }
 0x4c4   : > { %v1667_v16 = vpop.f32.mrf.mxu1  ;;  %v1015_v18 = vsel %vm572_vm4, %v1013_v15, -inf }
 0x4c5   : > { %v947_v19 = vmul.f32 %v945_v14, %v936_v13  ;;  %1016 = vmax.xlane.f32.xlu0 %v1015_v18 }
 0x4c6   : > { %v939_v20 = vpop.f32.mrf.mxu1 }
 0x4c7   : > { %v946_v22 = vmul.f32 0.5, %v939_v20  ;;  %v1014_v23 = vsel %vm1980_vm7, %v939_v20, -inf  ;;  %v949_v30 = vadd.f32 %v947_v19, %v943_v21  ;;  %v944_v31 = vadd.f32 1.0, %v939_v20 }
 0x4c8   : > { %v1668_v24 = vpop.f32.mrf.mxu1  ;;  %v1018_v28 = vsel %vm572_vm4, %v1014_v23, -inf }
 0x4c9   : > { %v948_v32 = vmul.f32 %v946_v22, %v939_v20  ;;  %1019 = vmax.xlane.f32.xlu1 %v1018_v28  ;;  %v951_v36 = vsel %vm1967_vm3, %v949_v30, 0.0 }
 0x4ca   : > { %v1001_v27 = vsel %vm572_vm4, %v951_v36, 0.0 }
 0x4cb   : > { %v950_v33 = vadd.f32 %v948_v32, %v944_v31 }
 0x4cd   : > { %v952_v37 = vsel %vm1971_vm5, %v950_v33, 0.0  ;;  %810 = vadd.xlane.f32.xlu1 %v809_v34 }
 0x4ce   : > { %v953_v38 = vpack.c.bf16 %v952_v37, %v951_v36  ;;  %v1004_v42 = vsel %vm572_vm4, %v952_v37, 0.0 }
 0x4d0   : > { %1672 = vmatmul.mubr.msk.bf16.vlgmr.msra.gmra.mxu0 %vm572_vm4, %v953_v38 }
 0x4d1   : > { %1682 = vmatpush3.bf16.xpose.msra.mxu0 %v1092_v39  ;;  %813 = vadd.xlane.f32.xlu1 %v812_v40 }
 0x4d2   : > { %1683 = vmatprep.mubr.msk.bf16.mxu0 %vm1816_vm1, %v1815_v17  ;;  %1693 = vmatprep.subr.bf16.mxu0 %v1815_v17 }
 0x4d5   : > { %1002 = vadd.xlane.f32.xlu1 %v1001_v27 }
 0x4d8   : > { %1684 = vmatmul.mubr.msk.bf16.vlgmr.msra.gmra.mxu0 %vm510_vm2, %v1085_v41 }
 0x4d9   : > { %1005 = vadd.xlane.f32.xlu1 %v1004_v42  ;;  %1695 = vmatprep.mubr.msk.bf16.mxu0 %vm1816_vm1, %v1815_v17 }
 0x4dd   : > { %836 = vadd.xlane.f32.xlu1 %v835_v29 }
 0x4e1   : > { %839 = vadd.xlane.f32.xlu1 %v838_v46 }
 0x4eb   : > { %v879_v47 = vpop.f32.mrf.mxu0 }
 0x4ed   : > { %v1661_v48 = vpop.f32.mrf.mxu0 }
 0x4ef   : > { %v2087_v49 = vpop.f32.mrf.mxu0 }
 0x4f1   : > { %v1662_v50 = vpop.f32.mrf.mxu0 }
 0x54e   : > { %v1017_v51 = vpop.xlane.xlu0 %1016 }
 0x54f   : > { %v1021_v52 = vsub.f32 %v1013_v15, %v1017_v51 }
 0x551   : > { %v1023_v53 = vmul.f32 1.442695, %v1021_v52 }
 0x552   : > { %v1020_v54 = vpop.xlane.xlu1 %1019 }
 0x553   : > { %1763 = vpow2.f32 %v1023_v53  ;;  %v1022_v56 = vsub.f32 %v1014_v23, %v1020_v54 }
 0x555   : > { %v1025_v57 = vmul.f32 1.442695, %v1022_v56 }
 0x556   : > { %v811_v61 = vpop.xlane.xlu1 %810 }
 0x557   : > { %1765 = vpow2.f32 %v1025_v57  ;;  %v815_v6 = vadd.f32 1e-08, %v811_v61 }
 0x559   : > { %1767 = vrcp.f32 %v815_v6 }
 0x55a   : > { %v814_v63 = vpop.xlane.xlu1 %813 }
 0x55b   : > { %v816_v61 = vadd.f32 1e-08, %v814_v63 }
 0x55e   : > { %v1003_v59 = vpop.xlane.xlu1 %1002 }
 0x55f   : > { %v1007_v21 = vadd.f32 1e-08, %v1003_v59  ;;  %v646_v59 = vsel %vm572_vm4, %v2028_v44, 0.0 }
 0x560   : > { %v1764_v3 = vpop.eup %1763 }
 0x561   : > { %v1027_v60 = vsel %vm572_vm4, %v1764_v3, 0.0 }
 0x562   : > { %1028 = vadd.xlane.f32.xlu1 %v1027_v60  ;;  %v1006_v8 = vpop.xlane.xlu1 %1005 }
 0x563   : > { %v1008_v22 = vadd.f32 1e-08, %v1006_v8 }
 0x564   : > { %v1766_v10 = vpop.eup %1765 }
 0x565   : > { %v1030_v12 = vsel %vm572_vm4, %v1766_v10, 0.0  ;;  %v1033_v13 = vpack.c.bf16 %v1766_v10, %v1764_v3 }
 0x566   : > { %1031 = vadd.xlane.f32.xlu1 %v1030_v12  ;;  %v837_v14 = vpop.xlane.xlu1 %836  ;;  %v1768_v15 = vpop.eup %1767 }
 0x567   : > { %1769 = vrcp.f32 %v837_v14  ;;  %1678 = vmatmul.mubr.msk.bf16.vlgmr.msra.gmra.mxu1 %vm572_vm4, %v1033_v13  ;;  %v819_v18 = vmul.f32 %v1768_v15, %v2057_v9 }
 0x568   : > { %1689 = vmatprep.mubr.msk.bf16.mxu1 %vm1816_vm1, %v1815_v17  ;;  %1771 = vrcp.f32 %v1007_v21 }
 0x569   : > { %1773 = vrcp.f32 %v1008_v22 }
 0x56a   : > { %v840_v57 = vpop.xlane.xlu1 %839 }
 0x56b   : > { %1775 = vrcp.f32 %v840_v57 }
 0x56c   : > { %1777 = vrcp.f32 %v816_v61 }
 0x574   : > { %v1770_v16 = vpop.eup %1769 }
 0x575   : > { %v888_v19 = vmul.f32 %v1770_v16, %v879_v47  ;;  %v1772_v23 = vpop.eup %1771 }
 0x576   : > { %v1774_v31 = vpop.eup %1773 }
 0x577   : > { %v2095_v20 = vadd.f32 %v888_v19, %v819_v18 }
 0x578   : > { %v1776_v55 = vpop.eup %1775 }
 0x579   : > { %v1778_v58 = vpop.eup %1777  ;;  %v889_v3 = vmul.f32 %v1776_v55, %v2087_v49 }
 0x57a   : > { %v820_v6 = vmul.f32 %v1778_v58, %v2059_v11 }
 0x57c   : > { %v891_v60 = vadd.f32 %v889_v3, %v820_v6 }
 0x590   : > { %v994_v24 = vpop.f32.mrf.mxu0 }
 0x591   : > { %v2097_v28 = vmul.f32 %v1772_v23, %v994_v24  ;;  %v617_v23 = vsel %vm572_vm4, %v1989_v25, 0.0  ;;  %v620_v24 = vsel %vm572_vm4, %v1993_v26, 0.0 }
 0x592   : > { %v1673_v30 = vpop.f32.mrf.mxu0 }
 0x594   : > { %v997_v32 = vpop.f32.mrf.mxu0 }
 0x595   : > { %v2099_v33 = vmul.f32 %v1774_v31, %v997_v32  ;;  %v643_v31 = vsel %vm572_vm4, %v2026_v43, 0.0 }
 0x596   : > { %v1674_v34 = vpop.f32.mrf.mxu0 }
 0x598   : > { %v1128_v35 = vpop.f32.mrf.mxu0 }
 0x599   : > { %v1137_v36 = vmul.f32 0.5, %v1128_v35  ;;  %v1205_v9 = vsel %vm1967_vm3, %v1128_v35, -inf  ;;  %v1135_v42 = vadd.f32 1.0, %v1128_v35 }
 0x59a   : > { %v1685_v37 = vpop.f32.mrf.mxu0  ;;  %v1207_v38 = vsel %vm572_vm4, %v1205_v9, -inf }
 0x59b   : > { %1208 = vmax.xlane.f32.xlu0 %v1207_v38  ;;  %v1139_v39 = vmul.f32 %v1137_v36, %v1128_v35 }
 0x59c   : > { %v1131_v40 = vpop.f32.mrf.mxu0 }
 0x59d   : > { %v1138_v27 = vmul.f32 0.5, %v1131_v40  ;;  %v1206_v41 = vsel %vm1980_vm7, %v1131_v40, -inf  ;;  %v1136_v47 = vadd.f32 1.0, %v1131_v40  ;;  %v1141_v50 = vadd.f32 %v1139_v39, %v1135_v42 }
 0x59e   : > { %v1686_v29 = vpop.f32.mrf.mxu0  ;;  %v1210_v46 = vsel %vm572_vm4, %v1206_v41, -inf }
 0x59f   : > { %1211 = vmax.xlane.f32.xlu0 %v1210_v46  ;;  %v1140_v48 = vmul.f32 %v1138_v27, %v1131_v40  ;;  %v1143_v53 = vsel %vm1967_vm3, %v1141_v50, 0.0 }
 0x5a0   : > { %v1193_v4 = vsel %vm572_vm4, %v1143_v53, 0.0 }
 0x5a1   : > { %v1142_v51 = vadd.f32 %v1140_v48, %v1136_v47 }
 0x5a3   : > { %v1144_v52 = vsel %vm1971_vm5, %v1142_v51, 0.0 }
 0x5a4   : > { %v1196_v54 = vsel %vm572_vm4, %v1144_v52, 0.0  ;;  %v1145_v56 = vpack.c.bf16 %v1144_v52, %v1143_v53 }
 0x5a5   : > { %1197 = vadd.xlane.f32.xlu1 %v1196_v54 }
 0x5b5   : > { %1146 = vrot.lane.b32.xlu0 %v1951_v45, %s1827_s12 }
 0x5d4   : > { %1194 = vadd.xlane.f32.xlu0 %v1193_v4 }
 0x5d8   : > { %647 = vadd.xlane.f32.xlu0 %v646_v59 }
 0x5eb   : > { %v1029_v30 = vpop.xlane.xlu1 %1028 }
 0x5ee   : > { %1280 = vrot.lane.b32.xlu0 %v891_v60, %s1828_s13 }
 0x5ef   : > { %v1032_v32 = vpop.xlane.xlu1 %1031 }
 0x624   : > { %v1209_v45 = vpop.xlane.xlu0 %1208 }
 0x625   : > { %v1213_v8 = vsub.f32 %v1205_v9, %v1209_v45 }
 0x627   : > { %v1215_v10 = vmul.f32 1.442695, %v1213_v8  ;;  %v1071_v63 = vpop.f32.mrf.mxu1 }
 0x628   : > { %v1212_v12 = vpop.xlane.xlu0 %1211 }
 0x629   : > { %1779 = vpow2.f32 %v1215_v10  ;;  %v1214_v44 = vsub.f32 %v1206_v41, %v1212_v12  ;;  %v1679_v13 = vpop.f32.mrf.mxu1 }
 0x62b   : > { %v1217_v14 = vmul.f32 1.442695, %v1214_v44  ;;  %v1074_v15 = vpop.f32.mrf.mxu1 }
 0x62c   : > { %v1147_v16 = vpop.permute.xlu0 %1146 }
 0x62d   : > { %1781 = vpow2.f32 %v1217_v14  ;;  %v1680_v18 = vpop.f32.mrf.mxu1  ;;  %1688 = vmatpush3.bf16.msra.mxu1 %v1147_v16  ;;  %1694 = vmatpush3.bf16.msra.mxu0 %v1147_v16 }
 0x62e   : > { %1699 = vmatprep.subr.bf16.mxu1 %v1815_v17  ;;  %1707 = vmatprep.subr.bf16.mxu0 %v1815_v17  ;;  %1783 = vrcp.f32 %v1029_v30  ;;  %v1198_v37 = vpop.xlane.xlu1 %1197 }
 0x62f   : > { %1785 = vrcp.f32 %v1032_v32  ;;  %v1200_v40 = vadd.f32 1e-08, %v1198_v37 }
 0x630   : > { %1690 = vmatmul.mubr.msk.bf16.vlgmr.msra.gmra.mxu1 %vm572_vm4, %v1145_v56 }
 0x631   : > { %1703 = vmatprep.mubr.msk.bf16.mxu1 %vm1816_vm1, %v1815_v17 }
 0x636   : > { %v1780_v11 = vpop.eup %1779 }
 0x637   : > { %v1219_v49 = vsel %vm572_vm4, %v1780_v11, 0.0 }
 0x638   : > { %1220 = vadd.xlane.f32.xlu1 %v1219_v49 }
 0x63a   : > { %v1782_v19 = vpop.eup %1781 }
 0x63b   : > { %v1222_v21 = vsel %vm572_vm4, %v1782_v19, 0.0  ;;  %v1225_v22 = vpack.c.bf16 %v1782_v19, %v1780_v11  ;;  %v1784_v34 = vpop.eup %1783 }
 0x63c   : > { %1223 = vadd.xlane.f32.xlu1 %v1222_v21  ;;  %v1080_v35 = vmul.f32 %v1784_v34, %v1071_v63  ;;  %v1786_v36 = vpop.eup %1785 }
 0x63d   : > { %1696 = vmatmul.mubr.msk.bf16.vlgmr.msra.gmra.mxu0 %vm572_vm4, %v1225_v22  ;;  %v1081_v9 = vmul.f32 %v1786_v36, %v1074_v15 }
 0x63e   : > { %1723 = vmatprep.mubr.msk.bf16.mxu0 %vm1816_vm1, %v1815_v17  ;;  %v1082_v25 = vadd.f32 %v1080_v35, %v2097_v28 }
 0x63f   : > { %v1083_v26 = vadd.f32 %v1081_v9, %v2099_v33 }
 0x640   : > { %618 = vadd.xlane.f32.xlu1 %v617_v23 }
 0x644   : > { %621 = vadd.xlane.f32.xlu1 %v620_v24 }
 0x648   : > { %644 = vadd.xlane.f32.xlu1 %v643_v31 }
 0x659   : > { %1278 = vrot.lane.b32.xlu1 %v2095_v20, %s1828_s13 }
 0x65d   : > { %1286 = vrot.lane.b32.xlu1 %v1082_v25, %s1829_s14  ;;  %v1195_v43 = vpop.xlane.xlu0 %1194 }
 0x65e   : > { %v1199_v38 = vadd.f32 1e-08, %v1195_v43 }
 0x660   : > { %1787 = vrcp.f32 %v1199_v38 }
 0x661   : > { %1288 = vrot.lane.b32.xlu1 %v1083_v26, %s1829_s14  ;;  %v648_v60 = vpop.xlane.xlu0 %647 }
 0x665   : > { %v1281_v11 = vpop.permute.xlu0 %1280 }
 0x66d   : > { %v1788_v29 = vpop.eup %1787 }
 0x6c1   : > { %v1221_v39 = vpop.xlane.xlu1 %1220 }
 0x6c2   : > { %1789 = vrcp.f32 %v1221_v39  ;;  %v1356_v39 = vld [vmem:[%s2261_s7 + $0x10] sm:$0xff] }
 0x6c3   : > { %1791 = vrcp.f32 %v1200_v40  ;;  %v1357_v40 = vld [vmem:[%s2261_s7 + $0x18] sm:$0xff] }
 0x6c5   : > { %v1224_v41 = vpop.xlane.xlu1 %1223 }
 0x6c6   : > { %1793 = vrcp.f32 %v1224_v41  ;;  %v1354_v41 = vld [vmem:[%s2261_s7] sm:$0xff] }
 0x6c9   : > { %v619_v59 = vpop.xlane.xlu1 %618 }
 0x6ca   : > { %v623_v3 = vadd.f32 1e-08, %v619_v59 }
 0x6cd   : > { %v622_v55 = vpop.xlane.xlu1 %621 }
 0x6ce   : > { %v624_v6 = vadd.f32 1e-08, %v622_v55 }
 0x6cf   : > { %v1790_v46 = vpop.eup %1789 }
 0x6d0   : > { %v1792_v51 = vpop.eup %1791 }
 0x6d1   : > { %v645_v58 = vpop.xlane.xlu1 %644 }
 0x6d2   : > { %1795 = vrcp.f32 %v645_v58 }
 0x6d3   : > { %v1794_v53 = vpop.eup %1793  ;;  %1797 = vrcp.f32 %v623_v3 }
 0x6d4   : > { %1799 = vrcp.f32 %v624_v6 }
 0x6d5   : > { %1801 = vrcp.f32 %v648_v60  ;;  %v1279_v10 = vpop.permute.xlu1 %1278 }
 0x6d9   : > { %v1287_v16 = vpop.permute.xlu1 %1286 }
 0x6dd   : > { %v1289_v22 = vpop.permute.xlu1 %1288 }
 0x6df   : > { %v1796_v45 = vpop.eup %1795 }
 0x6e0   : > { %v1798_v8 = vpop.eup %1797  ;;  %v696_v63 = vmul.f32 %v1796_v45, %v2053_v5 }
 0x6e1   : > { %v1800_v12 = vpop.eup %1799  ;;  %v627_v44 = vmul.f32 %v1798_v8, %v2049_v62 }
 0x6e2   : > { %v1802_v13 = vpop.eup %1801  ;;  %v628_v15 = vmul.f32 %v1800_v12, %v2051_v2 }
 0x6e3   : > { %v698_v14 = vadd.f32 %v696_v63, %v627_v44  ;;  %v697_v18 = vmul.f32 %v1802_v13, %v2055_v7  ;;  %v1572_v13 = vld [vmem:[%s2260_s6] ss:$0 sm:$0xff] }
 0x6e5   : > { %v1300_v49 = vsel %vm510_vm2, %v698_v14, %v1279_v10  ;;  %v699_v19 = vadd.f32 %v697_v18, %v628_v15  ;;  %v1571_v10 = vld [vmem:[%s2259_s5] ss:$0 sm:$0xff] }
 0x6e6   : > { %v1302_v21 = vsel %vm572_vm4, %v1300_v49, %v1287_v16  ;;  %v1419_v49 = vld [vmem:[%s2263_s9 + $0x28] sm:$0xff] }
 0x6e7   : > { %v1301_v5 = vsel %vm510_vm2, %v699_v19, %v1281_v11  ;;  %v1418_v11 = vld [vmem:[%s2263_s9 + $0x20] sm:$0xff] }
 0x6e8   : > { %v1303_v2 = vsel %vm572_vm4, %v1301_v5, %v1289_v22  ;;  %v1432_v19 = vpack.c.bf16 %v1419_v49, %v1418_v11  ;;  %v1417_v22 = vld [vmem:[%s2263_s9 + $0x18] sm:$0xff]  ;;  %v1414_v5 = vld [vmem:[%s2263_s9] sm:$0xff] }
 0x6f0   : > { %v1186_v27 = vpop.f32.mrf.mxu1 }
 0x6f1   : > { %v1203_v48 = vmul.f32 %v1788_v29, %v1186_v27  ;;  %v1359_v27 = vpack.c.bf16 %v1357_v40, %v1356_v39  ;;  %v1429_v29 = vld [vmem:[%s2263_s9 + $0x78] sm:$0xff] }
 0x6f2   : > { %v1691_v42 = vpop.f32.mrf.mxu1 }
 0x6f3   : > { %v1355_v42 = vld [vmem:[%s2261_s7 + $0x8] sm:$0xff]  ;;  %1700 = vmatpush3.bf16.msra.mxu1 %v1359_v27 }
 0x6f4   : > { %v1189_v20 = vpop.f32.mrf.mxu1  ;;  %1701 = vmatprep.subr.bf16.mxu1 %v1815_v17 }
 0x6f5   : > { %v1204_v56 = vmul.f32 %v1792_v51, %v1189_v20  ;;  %v1358_v20 = vpack.c.bf16 %v1355_v42, %v1354_v41  ;;  %v1425_v51 = vld [vmem:[%s2263_s9 + $0x58] sm:$0xff] }
 0x6f6   : > { %v1692_v28 = vpop.f32.mrf.mxu1 }
 0x6f7   : > { %1702 = vmatpush3.bf16.msra.mxu1 %v1358_v20  ;;  %v1428_v28 = vld [vmem:[%s2263_s9 + $0x70] sm:$0xff] }
 0x6fd   : > { %v1263_v47 = vpop.f32.mrf.mxu0 }
 0x6fe   : > { %v1272_v33 = vmul.f32 %v1790_v46, %v1263_v47  ;;  %v1426_v46 = vld [vmem:[%s2263_s9 + $0x60] sm:$0xff]  ;;  %v1437_v47 = vpack.c.bf16 %v1429_v29, %v1428_v28 }
 0x6ff   : > { %v1697_v50 = vpop.f32.mrf.mxu0 }
 0x700   : > { %v1274_v52 = vadd.f32 %v1272_v33, %v1203_v48  ;;  %v1427_v48 = vld [vmem:[%s2263_s9 + $0x68] sm:$0xff]  ;;  %1708 = vmatpush3.bf16.msra.mxu0 %v1437_v47  ;;  %v1424_v50 = vld [vmem:[%s2263_s9 + $0x50] sm:$0xff] }
 0x701   : > { %v1266_v54 = vpop.f32.mrf.mxu0  ;;  %v1436_v33 = vpack.c.bf16 %v1427_v48, %v1426_v46  ;;  %1709 = vmatprep.subr.bf16.mxu0 %v1815_v17 }
 0x702   : > { %v1273_v4 = vmul.f32 %v1794_v53, %v1266_v54  ;;  %1294 = vrot.lane.b32.xlu0 %v1274_v52, %s1830_s15  ;;  %v1435_v52 = vpack.c.bf16 %v1425_v51, %v1424_v50  ;;  %v1422_v53 = vld [vmem:[%s2263_s9 + $0x40] sm:$0xff]  ;;  %v1423_v54 = vld [vmem:[%s2263_s9 + $0x48] sm:$0xff] }
 0x703   : > { %v1698_v57 = vpop.f32.mrf.mxu0 }
 0x704   : > { %v1275_v61 = vadd.f32 %v1273_v4, %v1204_v56  ;;  %1710 = vmatpush3.bf16.msra.mxu0 %v1436_v33  ;;  %v1434_v56 = vpack.c.bf16 %v1423_v54, %v1422_v53  ;;  %v1420_v4 = vld [vmem:[%s2263_s9 + $0x30] sm:$0xff]  ;;  %v1421_v57 = vld [vmem:[%s2263_s9 + $0x38] sm:$0xff] }
 0x705   : > { %1711 = vmatprep.subr.bf16.mxu0 %v1815_v17 }
 0x706   : > { %1296 = vrot.lane.b32.xlu1 %v1275_v61, %s1830_s15  ;;  %v1433_v61 = vpack.c.bf16 %v1421_v57, %v1420_v4 }
 0x708   : > { %1712 = vmatpush3.bf16.msra.mxu0 %v1435_v52 }
 0x709   : > { %1713 = vmatprep.subr.bf16.mxu0 %v1815_v17 }
 0x70c   : > { %1714 = vmatpush3.bf16.msra.mxu0 %v1434_v56 }
 0x70d   : > { %1715 = vmatprep.subr.bf16.mxu0 %v1815_v17 }
 0x710   : > { %1716 = vmatpush3.bf16.msra.mxu0 %v1433_v61 }
 0x711   : > { %1717 = vmatprep.subr.bf16.mxu0 %v1815_v17 }
 0x714   : > { %1718 = vmatpush3.bf16.msra.mxu0 %v1432_v19 }
 0x715   : > { %1719 = vmatprep.subr.bf16.mxu0 %v1815_v17 }
 0x774   : > { %v1295_v23 = vpop.permute.xlu0 %1294 }
 0x775   : > { %v1305_v24 = vsel %vm1304_vm8, %v1302_v21, %v1295_v23  ;;  %v1416_v21 = vld [vmem:[%s2263_s9 + $0x10] sm:$0xff] }
 0x776   : > { %v2147_v62 = vadd.f32 %v1305_v24, %v1907_v0  ;;  %v1431_v23 = vpack.c.bf16 %v1417_v22, %v1416_v21  ;;  %v1415_v24 = vld [vmem:[%s2263_s9 + $0x8] sm:$0xff] }
 0x778   : > { %v1297_v30 = vpop.permute.xlu1 %1296  ;;  %v1311_v7 = vsel %vm392_vm0, %v2147_v62, 0.0  ;;  %1720 = vmatpush3.bf16.msra.mxu0 %v1431_v23 }
 0x779   : > { %v1306_v31 = vsel %vm1304_vm8, %v1303_v2, %v1297_v30  ;;  %1312 = vadd.xlane.f32.xlu0 %v1311_v7  ;;  %1721 = vmatprep.subr.bf16.mxu0 %v1815_v17  ;;  %v1430_v2 = vpack.c.bf16 %v1415_v24, %v1414_v5  ;;  %v1573_v30 = vld [vmem:[%s2262_s8] ss:$0 sm:$0xff] }
 0x77a   : > { %v2153_v32 = vadd.f32 %v1306_v31, %v1909_v1 }
 0x77c   : > { %v1314_v34 = vsel %vm392_vm0, %v2153_v32, 0.0  ;;  %1722 = vmatpush3.bf16.msra.mxu0 %v1430_v2 }
 0x77d   : > { %1315 = vadd.xlane.f32.xlu1 %v1314_v34 }
 0x802   : > { %v1313_v35 = vpop.xlane.xlu0 %1312 }
 0x803   : > { %v1317_v36 = vmul.f32 0.03125, %v1313_v35 }
 0x805   : > { %v1319_v0 = vsub.f32 %v2147_v62, %v1317_v36 }
 0x806   : > { %v1316_v25 = vpop.xlane.xlu1 %1315 }
 0x807   : > { %v1318_v9 = vmul.f32 0.03125, %v1316_v25  ;;  %v1321_v26 = vmul.f32 %v1319_v0, %v1319_v0 }
 0x809   : > { %v1320_v37 = vsub.f32 %v2153_v32, %v1318_v9  ;;  %v1323_v43 = vsel %vm392_vm0, %v1321_v26, 0.0  ;;  %v1575_v26 = vld [vmem:[%s2264_s10] ss:$0 sm:$0xff] }
 0x80a   : > { %1324 = vadd.xlane.f32.xlu0 %v1323_v43 }
 0x80b   : > { %v1322_v38 = vmul.f32 %v1320_v37, %v1320_v37 }
 0x80d   : > { %v1326_v1 = vsel %vm392_vm0, %v1322_v38, 0.0 }
 0x80e   : > { %1327 = vadd.xlane.f32.xlu0 %v1326_v1 }
 0x893   : > { %v1325_v59 = vpop.xlane.xlu0 %1324 }
 0x894   : > { %v1329_v55 = vmul.f32 0.03125, %v1325_v59 }
 0x896   : > { %v1331_v58 = vadd.f32 1e-05, %v1329_v55 }
 0x897   : > { %v1328_v3 = vpop.xlane.xlu0 %1327 }
 0x898   : > { %1803 = vrsqrt.f32 %v1331_v58  ;;  %v1330_v6 = vmul.f32 0.03125, %v1328_v3 }
 0x89a   : > { %v1332_v60 = vadd.f32 1e-05, %v1330_v6 }
 0x89c   : > { %1805 = vrsqrt.f32 %v1332_v60 }
 0x8a5   : > { %v1804_v45 = vpop.eup %1803 }
 0x8a6   : > { %v1335_v8 = vmul.f32 %v1804_v45, %v1319_v0 }
 0x8a8   : > { %v1343_v44 = vmul.f32 %v1571_v10, %v1335_v8 }
 0x8a9   : > { %v1806_v63 = vpop.eup %1805 }
 0x8aa   : > { %v1336_v12 = vmul.f32 %v1806_v63, %v1320_v37  ;;  %v1351_v15 = vadd.f32 %v1572_v13, %v1343_v44 }
 0x8ac   : > { %v1344_v14 = vmul.f32 %v1571_v10, %v1336_v12 }
 0x8ae   : > { %v1352_v16 = vadd.f32 %v1572_v13, %v1344_v14 }
 0x8b0   : > { %v1353_v18 = vpack.c.bf16 %v1352_v16, %v1351_v15 }
 0x8b2   : > { %1704 = vmatmul.mubr.msk.bf16.vlgmr.msra.gmra.mxu1 %vm392_vm0, %v1353_v18 }
 0x972   : > { %v1404_v7 = vpop.f32.mrf.mxu1 }
 0x973   : > { %v1405_v34 = vadd.f32 %v1573_v30, %v1404_v7 }
 0x974   : > { %v1705_v31 = vpop.f32.mrf.mxu1 }
 0x975   : > { %v1411_v0 = vmax.f32 %v1405_v34, 0.0 }
 0x976   : > { %v1407_v35 = vpop.f32.mrf.mxu1 }
 0x977   : > { %v1408_v17 = vadd.f32 %v1573_v30, %v1407_v35 }
 0x978   : > { %v1706_v36 = vpop.f32.mrf.mxu1 }
 0x979   : > { %v1412_v25 = vmax.f32 %v1408_v17, 0.0 }
 0x97b   : > { %v1413_v9 = vpack.c.bf16 %v1412_v25, %v1411_v0 }
 0x97d   : > { %1724 = vmatmul.mubr.bf16.vlgmr.msra.gmra.mxu0 %v1413_v9 }
 0xa3d   : > { %v1479_v37 = vpop.f32.mrf.mxu0 }
 0xa3e   : > { %v1480_v43 = vadd.f32 %v1575_v26, %v1479_v37 }
 0xa3f   : > { %v1725_v38 = vpop.f32.mrf.mxu0 }
 0xa40   : > { %v1486_v1 = vadd.f32 %v1480_v43, %v2147_v62 }
 0xa41   : > { %v1482_v39 = vpop.f32.mrf.mxu0 }
 0xa42   : > { %1488 = vst.msk [vmem:[%s386_s21] sm:$0xff] %vm392_vm0, %v1486_v1  ;;  %v1483_v40 = vadd.f32 %v1575_v26, %v1482_v39 }
 0xa43   : > { %v1726_v27 = vpop.f32.mrf.mxu0 }
 0xa44   : > { %v1487_v41 = vadd.f32 %v1483_v40, %v2153_v32 }
 0xa46   : > { %1489 = vst.msk [vmem:[%s386_s21 + $0x8] sm:$0xff] %vm392_vm0, %v1487_v41 }
 0xa47 PF: > { %s21_s17 = sadd.s32 1, %s1813_s17  }
 0xa48   : > { %p18_p4 = scmp.ge.s32.totalorder %s21_s17, 4  }
 0xa4a   :  { %20 = sbr.rel (!%p18_p4) target bundleno = 1 (0x1), region = 94 }

</bundles_post_ra>
